<compile_context>
chip_gen: v5e
topology: v5e:2x2
jax: 0.10.0
libtpu: 0.0.40
codegen_flags: <defaults>
</compile_context>

<pallas_src>
import numpy as np
import jax
import jax.numpy as jnp
from jax.experimental import pallas as pl
from jax.experimental.pallas import tpu as pltpu

EPS = 1e-5  # nn.InstanceNorm2d default eps, affine=False, biased variance


def _fuse_weights(w, C, Cp):
    """(C, C, 3, 3) torch OIHW -> (Cp, 9*Cp) bf16 with
    Wf[co, (kh*3+kw)*Cp + ci] = w[co, ci, kh, kw] (zero-padded channels)."""
    wt = jnp.transpose(w, (0, 2, 3, 1)).reshape(C, 9, C)   # (co, tap, ci)
    wt = jnp.pad(wt, ((0, Cp - C), (0, 0), (0, Cp - C)))
    return wt.reshape(Cp, 9 * Cp).astype(jnp.bfloat16)


def residual_block(x, w1, b1, w2, b2):
    """x: (N, C, H, W) f32; wX: (C, C, 3, 3); bX: (C,). Returns (N, C, H, W)."""
    N, C, H, W = x.shape
    HW = H * W
    Cp = ((C + 15) // 16) * 16          # channel pad: sublane + bf16-tile aligned

    # ---- layout / dtype prep (plain JAX glue) ------------------------------
    x2 = jnp.pad(x.reshape(N, C, HW).astype(jnp.float32),
                 ((0, 0), (0, Cp - C), (0, 0)))
    w1f = _fuse_weights(w1, C, Cp)
    w2f = _fuse_weights(w2, C, Cp)
    b1c = jnp.pad(b1.astype(jnp.float32), (0, Cp - C)).reshape(Cp, 1)
    b2c = jnp.pad(b2.astype(jnp.float32), (0, Cp - C)).reshape(Cp, 1)

    def kernel(x_ref, w1_ref, b1_ref, w2_ref, b2_ref, o_ref, slab_ref):
        xin = x_ref[...]                                        # (Cp, HW) f32

        # Reflection-edge masks over the flattened spatial (lane) axis.
        lane = jax.lax.broadcasted_iota(jnp.int32, (Cp, HW), 1)
        col = lane % W
        row0, row_last = lane < W, lane >= HW - W
        col0, col_last = col == 0, col == W - 1

        def conv3x3(y, w_ref, b_ref):
            # Row-shifted variants (reflection fix-up at top / bottom row).
            yd = pltpu.roll(y, shift=W, axis=1)        # [i] = y[i - W]  (row h-1)
            yu = pltpu.roll(y, shift=HW - W, axis=1)   # [i] = y[i + W]  (row h+1)
            rows = (jnp.where(row0, yu, yd),           # kh=0: row -1 -> row 1
                    y,                                 # kh=1
                    jnp.where(row_last, yd, yu))       # kh=2: row H  -> row H-2
            for kh in range(3):
                a = rows[kh]
                al = pltpu.roll(a, shift=1, axis=1)        # [i] = a[i - 1]
                ar = pltpu.roll(a, shift=HW - 1, axis=1)   # [i] = a[i + 1]
                taps = (jnp.where(col0, ar, al),           # kw=0: col -1 -> col 1
                        a,                                 # kw=1
                        jnp.where(col_last, al, ar))       # kw=2: col W -> col W-2
                for kw in range(3):
                    slab_ref[pl.ds((kh * 3 + kw) * Cp, Cp), :] = (
                        taps[kw].astype(jnp.bfloat16))
            # One fused MXU matmul per conv: (Cp, 9Cp) @ (9Cp, HW), f32 accum.
            out = jnp.dot(w_ref[...], slab_ref[...],
                          preferred_element_type=jnp.float32)
            return out + b_ref[...]

        def instance_norm(y):        # per-channel over spatial, biased variance
            m = jnp.mean(y, axis=1, keepdims=True)
            d = y - m
            v = jnp.mean(d * d, axis=1, keepdims=True)
            return d * jax.lax.rsqrt(v + EPS)

        y = jnp.maximum(instance_norm(conv3x3(xin, w1_ref, b1_ref)), 0.0)
        y = instance_norm(conv3x3(y, w2_ref, b2_ref))
        o_ref[...] = (xin + y).astype(o_ref.dtype)              # residual add

    out2 = pl.pallas_call(
        kernel,
        out_shape=jax.ShapeDtypeStruct((N, Cp, HW), jnp.float32),
        grid=(N,),
        in_specs=[
            pl.BlockSpec((None, Cp, HW), lambda n: (n, 0, 0)),   # x (one sample)
            pl.BlockSpec((Cp, 9 * Cp), lambda n: (0, 0)),        # conv1 fused W
            pl.BlockSpec((Cp, 1), lambda n: (0, 0)),             # conv1 bias
            pl.BlockSpec((Cp, 9 * Cp), lambda n: (0, 0)),        # conv2 fused W
            pl.BlockSpec((Cp, 1), lambda n: (0, 0)),             # conv2 bias
        ],
        out_specs=pl.BlockSpec((None, Cp, HW), lambda n: (n, 0, 0)),
        scratch_shapes=[pltpu.VMEM((9 * Cp, HW), jnp.bfloat16)],  # shifted slab
        compiler_params=pltpu.CompilerParams(
            dimension_semantics=("parallel",),
            vmem_limit_bytes=32 * 1024 * 1024),
    )(x2, w1f, b1c, w2f, b2c)

    return out2[:, :C, :].reshape(N, C, H, W)


# ---- pure-JAX reference (mirrors the PyTorch module, all f32) --------------
def _reference(x, w1, b1, w2, b2):
    def conv(y, w, b):
        yp = jnp.pad(y, ((0, 0), (0, 0), (1, 1), (1, 1)), mode="reflect")
        out = jax.lax.conv_general_dilated(
            yp, w, window_strides=(1, 1), padding="VALID",
            dimension_numbers=("NCHW", "OIHW", "NCHW"))
        return out + b[None, :, None, None]

    def inorm(y):
        m = jnp.mean(y, axis=(2, 3), keepdims=True)
        v = jnp.mean((y - m) ** 2, axis=(2, 3), keepdims=True)
        return (y - m) / jnp.sqrt(v + EPS)

    y = jax.nn.relu(inorm(conv(x, w1, b1)))
    y = inorm(conv(y, w2, b2))
    return x + y


if __name__ == "__main__":
    N, C, H, W = 2, 4, 16, 16
    key = jax.random.PRNGKey(0)
    kx, kw1, kb1, kw2, kb2 = jax.random.split(key, 5)

    # Deterministic, PyTorch-like (uniform +/- 1/sqrt(fan_in)) init.
    fan_in = C * 3 * 3
    bound = 1.0 / np.sqrt(fan_in)
    w1 = jax.random.uniform(kw1, (C, C, 3, 3), jnp.float32, -bound, bound)
    b1 = jax.random.uniform(kb1, (C,), jnp.float32, -bound, bound)
    w2 = jax.random.uniform(kw2, (C, C, 3, 3), jnp.float32, -bound, bound)
    b2 = jax.random.uniform(kb2, (C,), jnp.float32, -bound, bound)
    x = jax.random.normal(kx, (N, C, H, W), jnp.float32)

    out = jax.block_until_ready(residual_block(x, w1, b1, w2, b2))
    ref = jax.block_until_ready(_reference(x, w1, b1, w2, b2))

    assert out.shape == (N, C, H, W) and out.dtype == jnp.float32
    # Tolerance accounts for bf16 MXU operands (f32 accumulation) vs f32 reference.
    np.testing.assert_allclose(np.asarray(out), np.asarray(ref),
                               rtol=5e-2, atol=5e-2)
    print("KERNEL_OK")
</pallas_src>

<mosaic_0001>
module attributes {stable_mosaic.version = 11 : i64} {
  func.func @kernel(%arg0: i32, %arg1: memref<1x16x256xf32, #tpu.memory_space<vmem>>, %arg2: memref<16x144xbf16, #tpu.memory_space<vmem>>, %arg3: memref<16x1xf32, #tpu.memory_space<vmem>>, %arg4: memref<16x144xbf16, #tpu.memory_space<vmem>>, %arg5: memref<16x1xf32, #tpu.memory_space<vmem>>, %arg6: memref<1x16x256xf32, #tpu.memory_space<vmem>>, %arg7: memref<144x256xbf16, #tpu.memory_space<vmem>>) attributes {dimension_semantics = [#tpu.dimension_semantics<parallel>], iteration_bounds = array<i64: 2>, scalar_prefetch = 0 : i64, scratch_operands = 1 : i64, tpu.core_type = #tpu.core_type<tc>, window_params = [{transform_indices = @transform_0, window_bounds = array<i64: 1, 16, 256>}, {pipeline_mode = #tpu.pipeline_mode<synchronous>, transform_indices = @transform_1, window_bounds = array<i64: 16, 144>}, {pipeline_mode = #tpu.pipeline_mode<synchronous>, transform_indices = @transform_2, window_bounds = array<i64: 16, 1>}, {pipeline_mode = #tpu.pipeline_mode<synchronous>, transform_indices = @transform_3, window_bounds = array<i64: 16, 144>}, {pipeline_mode = #tpu.pipeline_mode<synchronous>, transform_indices = @transform_4, window_bounds = array<i64: 16, 1>}, {transform_indices = @transform_5, window_bounds = array<i64: 1, 16, 256>}]} {
    %c0 = arith.constant 0 : index
    %c0_0 = arith.constant 0 : index
    %c0_1 = arith.constant 0 : index
    %0 = vector.load %arg1[%c0, %c0_0, %c0_1] : memref<1x16x256xf32, #tpu.memory_space<vmem>>, vector<1x16x256xf32>
    %1 = vector.shape_cast %0 : vector<1x16x256xf32> to vector<16x256xf32>
    %2 = tpu.iota {dimensions = array<i32: 1>} : vector<16x256xi32>
    %c16_i32 = arith.constant 16 : i32
    %c0_i32 = arith.constant 0 : i32
    %3 = arith.cmpi eq, %c16_i32, %c0_i32 : i32
    %c1_i32 = arith.constant 1 : i32
    %4 = arith.select %3, %c1_i32, %c16_i32 : i32
    %5 = vector.broadcast %4 : i32 to vector<16x256xi32>
    %6 = arith.remsi %2, %5 : vector<16x256xi32>
    %c0_i32_2 = arith.constant 0 : i32
    %7 = vector.broadcast %c0_i32_2 : i32 to vector<16x256xi32>
    %8 = arith.cmpi ne, %6, %7 : vector<16x256xi32>
    %c0_i32_3 = arith.constant 0 : i32
    %9 = vector.broadcast %c0_i32_3 : i32 to vector<16x256xi32>
    %10 = arith.cmpi slt, %6, %9 : vector<16x256xi32>
    %c0_i32_4 = arith.constant 0 : i32
    %11 = arith.cmpi slt, %4, %c0_i32_4 : i32
    %12 = vector.broadcast %11 : i1 to vector<16x256xi1>
    %13 = vector.broadcast %12 : vector<16x256xi1> to vector<16x256xi1>
    %14 = arith.xori %10, %13 : vector<16x256xi1>
    %15 = arith.andi %14, %8 : vector<16x256xi1>
    %16 = vector.broadcast %4 : i32 to vector<16x256xi32>
    %17 = arith.addi %6, %16 : vector<16x256xi32>
    %18 = arith.select %15, %17, %6 : vector<16x256xi1>, vector<16x256xi32>
    %c16_i32_5 = arith.constant 16 : i32
    %19 = vector.broadcast %c16_i32_5 : i32 to vector<16x256xi32>
    %20 = arith.cmpi slt, %2, %19 : vector<16x256xi32>
    %c240_i32 = arith.constant 240 : i32
    %21 = vector.broadcast %c240_i32 : i32 to vector<16x256xi32>
    %22 = arith.cmpi sge, %2, %21 : vector<16x256xi32>
    %c0_i32_6 = arith.constant 0 : i32
    %23 = vector.broadcast %c0_i32_6 : i32 to vector<16x256xi32>
    %24 = arith.cmpi eq, %18, %23 : vector<16x256xi32>
    %c15_i32 = arith.constant 15 : i32
    %25 = vector.broadcast %c15_i32 : i32 to vector<16x256xi32>
    %26 = arith.cmpi eq, %18, %25 : vector<16x256xi32>
    %c16_i32_7 = arith.constant 16 : i32
    %27 = tpu.dynamic_rotate %1 by %c16_i32_7 dim 1 : vector<16x256xf32>, i32 -> vector<16x256xf32>
    %c240_i32_8 = arith.constant 240 : i32
    %28 = tpu.dynamic_rotate %1 by %c240_i32_8 dim 1 : vector<16x256xf32>, i32 -> vector<16x256xf32>
    %29 = arith.select %20, %28, %27 : vector<16x256xi1>, vector<16x256xf32>
    %30 = arith.select %22, %27, %28 : vector<16x256xi1>, vector<16x256xf32>
    %c1_i32_9 = arith.constant 1 : i32
    %31 = tpu.dynamic_rotate %29 by %c1_i32_9 dim 1 : vector<16x256xf32>, i32 -> vector<16x256xf32>
    %c255_i32 = arith.constant 255 : i32
    %32 = tpu.dynamic_rotate %29 by %c255_i32 dim 1 : vector<16x256xf32>, i32 -> vector<16x256xf32>
    %33 = arith.select %24, %32, %31 : vector<16x256xi1>, vector<16x256xf32>
    %34 = arith.select %26, %31, %32 : vector<16x256xi1>, vector<16x256xf32>
    %35 = arith.truncf %33 : vector<16x256xf32> to vector<16x256xbf16>
    %c0_10 = arith.constant 0 : index
    %c0_11 = arith.constant 0 : index
    %36 = vector.load %arg7[%c0_10, %c0_11] : memref<144x256xbf16, #tpu.memory_space<vmem>>, vector<16x256xbf16>
    tpu.vector_store %arg7[%c0_10, %c0_11], %35 {strides = array<i32>} : memref<144x256xbf16, #tpu.memory_space<vmem>>, vector<16x256xbf16>,
    %37 = arith.truncf %29 : vector<16x256xf32> to vector<16x256xbf16>
    %c16 = arith.constant 16 : index
    %c0_12 = arith.constant 0 : index
    %38 = vector.load %arg7[%c16, %c0_12] : memref<144x256xbf16, #tpu.memory_space<vmem>>, vector<16x256xbf16>
    tpu.vector_store %arg7[%c16, %c0_12], %37 {strides = array<i32>} : memref<144x256xbf16, #tpu.memory_space<vmem>>, vector<16x256xbf16>,
    %39 = arith.truncf %34 : vector<16x256xf32> to vector<16x256xbf16>
    %c32 = arith.constant 32 : index
    %c0_13 = arith.constant 0 : index
    %40 = vector.load %arg7[%c32, %c0_13] : memref<144x256xbf16, #tpu.memory_space<vmem>>, vector<16x256xbf16>
    tpu.vector_store %arg7[%c32, %c0_13], %39 {strides = array<i32>} : memref<144x256xbf16, #tpu.memory_space<vmem>>, vector<16x256xbf16>,
    %c1_i32_14 = arith.constant 1 : i32
    %41 = tpu.dynamic_rotate %1 by %c1_i32_14 dim 1 : vector<16x256xf32>, i32 -> vector<16x256xf32>
    %c255_i32_15 = arith.constant 255 : i32
    %42 = tpu.dynamic_rotate %1 by %c255_i32_15 dim 1 : vector<16x256xf32>, i32 -> vector<16x256xf32>
    %43 = arith.select %24, %42, %41 : vector<16x256xi1>, vector<16x256xf32>
    %44 = arith.select %26, %41, %42 : vector<16x256xi1>, vector<16x256xf32>
    %45 = arith.truncf %43 : vector<16x256xf32> to vector<16x256xbf16>
    %c48 = arith.constant 48 : index
    %c0_16 = arith.constant 0 : index
    %46 = vector.load %arg7[%c48, %c0_16] : memref<144x256xbf16, #tpu.memory_space<vmem>>, vector<16x256xbf16>
    tpu.vector_store %arg7[%c48, %c0_16], %45 {strides = array<i32>} : memref<144x256xbf16, #tpu.memory_space<vmem>>, vector<16x256xbf16>,
    %47 = arith.truncf %1 : vector<16x256xf32> to vector<16x256xbf16>
    %c64 = arith.constant 64 : index
    %c0_17 = arith.constant 0 : index
    %48 = vector.load %arg7[%c64, %c0_17] : memref<144x256xbf16, #tpu.memory_space<vmem>>, vector<16x256xbf16>
    tpu.vector_store %arg7[%c64, %c0_17], %47 {strides = array<i32>} : memref<144x256xbf16, #tpu.memory_space<vmem>>, vector<16x256xbf16>,
    %49 = arith.truncf %44 : vector<16x256xf32> to vector<16x256xbf16>
    %c80 = arith.constant 80 : index
    %c0_18 = arith.constant 0 : index
    %50 = vector.load %arg7[%c80, %c0_18] : memref<144x256xbf16, #tpu.memory_space<vmem>>, vector<16x256xbf16>
    tpu.vector_store %arg7[%c80, %c0_18], %49 {strides = array<i32>} : memref<144x256xbf16, #tpu.memory_space<vmem>>, vector<16x256xbf16>,
    %c1_i32_19 = arith.constant 1 : i32
    %51 = tpu.dynamic_rotate %30 by %c1_i32_19 dim 1 : vector<16x256xf32>, i32 -> vector<16x256xf32>
    %c255_i32_20 = arith.constant 255 : i32
    %52 = tpu.dynamic_rotate %30 by %c255_i32_20 dim 1 : vector<16x256xf32>, i32 -> vector<16x256xf32>
    %53 = arith.select %24, %52, %51 : vector<16x256xi1>, vector<16x256xf32>
    %54 = arith.select %26, %51, %52 : vector<16x256xi1>, vector<16x256xf32>
    %55 = arith.truncf %53 : vector<16x256xf32> to vector<16x256xbf16>
    %c96 = arith.constant 96 : index
    %c0_21 = arith.constant 0 : index
    %56 = vector.load %arg7[%c96, %c0_21] : memref<144x256xbf16, #tpu.memory_space<vmem>>, vector<16x256xbf16>
    tpu.vector_store %arg7[%c96, %c0_21], %55 {strides = array<i32>} : memref<144x256xbf16, #tpu.memory_space<vmem>>, vector<16x256xbf16>,
    %57 = arith.truncf %30 : vector<16x256xf32> to vector<16x256xbf16>
    %c112 = arith.constant 112 : index
    %c0_22 = arith.constant 0 : index
    %58 = vector.load %arg7[%c112, %c0_22] : memref<144x256xbf16, #tpu.memory_space<vmem>>, vector<16x256xbf16>
    tpu.vector_store %arg7[%c112, %c0_22], %57 {strides = array<i32>} : memref<144x256xbf16, #tpu.memory_space<vmem>>, vector<16x256xbf16>,
    %59 = arith.truncf %54 : vector<16x256xf32> to vector<16x256xbf16>
    %c128 = arith.constant 128 : index
    %c0_23 = arith.constant 0 : index
    %60 = vector.load %arg7[%c128, %c0_23] : memref<144x256xbf16, #tpu.memory_space<vmem>>, vector<16x256xbf16>
    tpu.vector_store %arg7[%c128, %c0_23], %59 {strides = array<i32>} : memref<144x256xbf16, #tpu.memory_space<vmem>>, vector<16x256xbf16>,
    %c0_24 = arith.constant 0 : index
    %c0_25 = arith.constant 0 : index
    %61 = vector.load %arg2[%c0_24, %c0_25] : memref<16x144xbf16, #tpu.memory_space<vmem>>, vector<16x144xbf16>
    %c0_26 = arith.constant 0 : index
    %c0_27 = arith.constant 0 : index
    %62 = vector.load %arg7[%c0_26, %c0_27] : memref<144x256xbf16, #tpu.memory_space<vmem>>, vector<144x256xbf16>
    %cst = arith.constant dense<0.000000e+00> : vector<16x256xf32>
    %63 = tpu.matmul %61, %62, %cst {dimension_numbers = #tpu.dot_dimension_numbers<[1], [0], [0], [1], [0, 0, 1, 1], [], []>} : vector<16x144xbf16>, vector<144x256xbf16>, vector<16x256xf32> -> vector<16x256xf32>
    %c0_28 = arith.constant 0 : index
    %c0_29 = arith.constant 0 : index
    %64 = vector.load %arg3[%c0_28, %c0_29] : memref<16x1xf32, #tpu.memory_space<vmem>>, vector<16x1xf32>
    %65 = vector.broadcast %64 : vector<16x1xf32> to vector<16x256xf32>
    %66 = arith.addf %63, %65 : vector<16x256xf32>
    %cst_30 = arith.constant dense<0.000000e+00> : vector<16xf32>
    %67 = vector.multi_reduction <add>, %66, %cst_30 [1] : vector<16x256xf32> to vector<16xf32>
    %68 = vector.shape_cast %67 : vector<16xf32> to vector<16x1xf32>
    %cst_31 = arith.constant 2.560000e+02 : f32
    %69 = vector.broadcast %cst_31 : f32 to vector<16x1xf32>
    %70 = arith.divf %68, %69 : vector<16x1xf32>
    %71 = vector.broadcast %70 : vector<16x1xf32> to vector<16x256xf32>
    %72 = arith.subf %66, %71 : vector<16x256xf32>
    %73 = arith.mulf %72, %72 : vector<16x256xf32>
    %cst_32 = arith.constant dense<0.000000e+00> : vector<16xf32>
    %74 = vector.multi_reduction <add>, %73, %cst_32 [1] : vector<16x256xf32> to vector<16xf32>
    %75 = vector.shape_cast %74 : vector<16xf32> to vector<16x1xf32>
    %cst_33 = arith.constant 2.560000e+02 : f32
    %76 = vector.broadcast %cst_33 : f32 to vector<16x1xf32>
    %77 = arith.divf %75, %76 : vector<16x1xf32>
    %cst_34 = arith.constant 9.99999974E-6 : f32
    %78 = vector.broadcast %cst_34 : f32 to vector<16x1xf32>
    %79 = arith.addf %77, %78 : vector<16x1xf32>
    %80 = math.rsqrt %79 : vector<16x1xf32>
    %81 = vector.broadcast %80 : vector<16x1xf32> to vector<16x256xf32>
    %82 = arith.mulf %72, %81 : vector<16x256xf32>
    %cst_35 = arith.constant 0.000000e+00 : f32
    %83 = vector.broadcast %cst_35 : f32 to vector<16x256xf32>
    %84 = arith.maximumf %82, %83 : vector<16x256xf32>
    %c16_i32_36 = arith.constant 16 : i32
    %85 = tpu.dynamic_rotate %84 by %c16_i32_36 dim 1 : vector<16x256xf32>, i32 -> vector<16x256xf32>
    %c240_i32_37 = arith.constant 240 : i32
    %86 = tpu.dynamic_rotate %84 by %c240_i32_37 dim 1 : vector<16x256xf32>, i32 -> vector<16x256xf32>
    %87 = arith.select %20, %86, %85 : vector<16x256xi1>, vector<16x256xf32>
    %88 = arith.select %22, %85, %86 : vector<16x256xi1>, vector<16x256xf32>
    %c1_i32_38 = arith.constant 1 : i32
    %89 = tpu.dynamic_rotate %87 by %c1_i32_38 dim 1 : vector<16x256xf32>, i32 -> vector<16x256xf32>
    %c255_i32_39 = arith.constant 255 : i32
    %90 = tpu.dynamic_rotate %87 by %c255_i32_39 dim 1 : vector<16x256xf32>, i32 -> vector<16x256xf32>
    %91 = arith.select %24, %90, %89 : vector<16x256xi1>, vector<16x256xf32>
    %92 = arith.select %26, %89, %90 : vector<16x256xi1>, vector<16x256xf32>
    %93 = arith.truncf %91 : vector<16x256xf32> to vector<16x256xbf16>
    %c0_40 = arith.constant 0 : index
    %c0_41 = arith.constant 0 : index
    %94 = vector.load %arg7[%c0_40, %c0_41] : memref<144x256xbf16, #tpu.memory_space<vmem>>, vector<16x256xbf16>
    tpu.vector_store %arg7[%c0_40, %c0_41], %93 {strides = array<i32>} : memref<144x256xbf16, #tpu.memory_space<vmem>>, vector<16x256xbf16>,
    %95 = arith.truncf %87 : vector<16x256xf32> to vector<16x256xbf16>
    %c16_42 = arith.constant 16 : index
    %c0_43 = arith.constant 0 : index
    %96 = vector.load %arg7[%c16_42, %c0_43] : memref<144x256xbf16, #tpu.memory_space<vmem>>, vector<16x256xbf16>
    tpu.vector_store %arg7[%c16_42, %c0_43], %95 {strides = array<i32>} : memref<144x256xbf16, #tpu.memory_space<vmem>>, vector<16x256xbf16>,
    %97 = arith.truncf %92 : vector<16x256xf32> to vector<16x256xbf16>
    %c32_44 = arith.constant 32 : index
    %c0_45 = arith.constant 0 : index
    %98 = vector.load %arg7[%c32_44, %c0_45] : memref<144x256xbf16, #tpu.memory_space<vmem>>, vector<16x256xbf16>
    tpu.vector_store %arg7[%c32_44, %c0_45], %97 {strides = array<i32>} : memref<144x256xbf16, #tpu.memory_space<vmem>>, vector<16x256xbf16>,
    %c1_i32_46 = arith.constant 1 : i32
    %99 = tpu.dynamic_rotate %84 by %c1_i32_46 dim 1 : vector<16x256xf32>, i32 -> vector<16x256xf32>
    %c255_i32_47 = arith.constant 255 : i32
    %100 = tpu.dynamic_rotate %84 by %c255_i32_47 dim 1 : vector<16x256xf32>, i32 -> vector<16x256xf32>
    %101 = arith.select %24, %100, %99 : vector<16x256xi1>, vector<16x256xf32>
    %102 = arith.select %26, %99, %100 : vector<16x256xi1>, vector<16x256xf32>
    %103 = arith.truncf %101 : vector<16x256xf32> to vector<16x256xbf16>
    %c48_48 = arith.constant 48 : index
    %c0_49 = arith.constant 0 : index
    %104 = vector.load %arg7[%c48_48, %c0_49] : memref<144x256xbf16, #tpu.memory_space<vmem>>, vector<16x256xbf16>
    tpu.vector_store %arg7[%c48_48, %c0_49], %103 {strides = array<i32>} : memref<144x256xbf16, #tpu.memory_space<vmem>>, vector<16x256xbf16>,
    %105 = arith.truncf %84 : vector<16x256xf32> to vector<16x256xbf16>
    %c64_50 = arith.constant 64 : index
    %c0_51 = arith.constant 0 : index
    %106 = vector.load %arg7[%c64_50, %c0_51] : memref<144x256xbf16, #tpu.memory_space<vmem>>, vector<16x256xbf16>
    tpu.vector_store %arg7[%c64_50, %c0_51], %105 {strides = array<i32>} : memref<144x256xbf16, #tpu.memory_space<vmem>>, vector<16x256xbf16>,
    %107 = arith.truncf %102 : vector<16x256xf32> to vector<16x256xbf16>
    %c80_52 = arith.constant 80 : index
    %c0_53 = arith.constant 0 : index
    %108 = vector.load %arg7[%c80_52, %c0_53] : memref<144x256xbf16, #tpu.memory_space<vmem>>, vector<16x256xbf16>
    tpu.vector_store %arg7[%c80_52, %c0_53], %107 {strides = array<i32>} : memref<144x256xbf16, #tpu.memory_space<vmem>>, vector<16x256xbf16>,
    %c1_i32_54 = arith.constant 1 : i32
    %109 = tpu.dynamic_rotate %88 by %c1_i32_54 dim 1 : vector<16x256xf32>, i32 -> vector<16x256xf32>
    %c255_i32_55 = arith.constant 255 : i32
    %110 = tpu.dynamic_rotate %88 by %c255_i32_55 dim 1 : vector<16x256xf32>, i32 -> vector<16x256xf32>
    %111 = arith.select %24, %110, %109 : vector<16x256xi1>, vector<16x256xf32>
    %112 = arith.select %26, %109, %110 : vector<16x256xi1>, vector<16x256xf32>
    %113 = arith.truncf %111 : vector<16x256xf32> to vector<16x256xbf16>
    %c96_56 = arith.constant 96 : index
    %c0_57 = arith.constant 0 : index
    %114 = vector.load %arg7[%c96_56, %c0_57] : memref<144x256xbf16, #tpu.memory_space<vmem>>, vector<16x256xbf16>
    tpu.vector_store %arg7[%c96_56, %c0_57], %113 {strides = array<i32>} : memref<144x256xbf16, #tpu.memory_space<vmem>>, vector<16x256xbf16>,
    %115 = arith.truncf %88 : vector<16x256xf32> to vector<16x256xbf16>
    %c112_58 = arith.constant 112 : index
    %c0_59 = arith.constant 0 : index
    %116 = vector.load %arg7[%c112_58, %c0_59] : memref<144x256xbf16, #tpu.memory_space<vmem>>, vector<16x256xbf16>
    tpu.vector_store %arg7[%c112_58, %c0_59], %115 {strides = array<i32>} : memref<144x256xbf16, #tpu.memory_space<vmem>>, vector<16x256xbf16>,
    %117 = arith.truncf %112 : vector<16x256xf32> to vector<16x256xbf16>
    %c128_60 = arith.constant 128 : index
    %c0_61 = arith.constant 0 : index
    %118 = vector.load %arg7[%c128_60, %c0_61] : memref<144x256xbf16, #tpu.memory_space<vmem>>, vector<16x256xbf16>
    tpu.vector_store %arg7[%c128_60, %c0_61], %117 {strides = array<i32>} : memref<144x256xbf16, #tpu.memory_space<vmem>>, vector<16x256xbf16>,
    %c0_62 = arith.constant 0 : index
    %c0_63 = arith.constant 0 : index
    %119 = vector.load %arg4[%c0_62, %c0_63] : memref<16x144xbf16, #tpu.memory_space<vmem>>, vector<16x144xbf16>
    %c0_64 = arith.constant 0 : index
    %c0_65 = arith.constant 0 : index
    %120 = vector.load %arg7[%c0_64, %c0_65] : memref<144x256xbf16, #tpu.memory_space<vmem>>, vector<144x256xbf16>
    %cst_66 = arith.constant dense<0.000000e+00> : vector<16x256xf32>
    %121 = tpu.matmul %119, %120, %cst_66 {dimension_numbers = #tpu.dot_dimension_numbers<[1], [0], [0], [1], [0, 0, 1, 1], [], []>} : vector<16x144xbf16>, vector<144x256xbf16>, vector<16x256xf32> -> vector<16x256xf32>
    %c0_67 = arith.constant 0 : index
    %c0_68 = arith.constant 0 : index
    %122 = vector.load %arg5[%c0_67, %c0_68] : memref<16x1xf32, #tpu.memory_space<vmem>>, vector<16x1xf32>
    %123 = vector.broadcast %122 : vector<16x1xf32> to vector<16x256xf32>
    %124 = arith.addf %121, %123 : vector<16x256xf32>
    %cst_69 = arith.constant dense<0.000000e+00> : vector<16xf32>
    %125 = vector.multi_reduction <add>, %124, %cst_69 [1] : vector<16x256xf32> to vector<16xf32>
    %126 = vector.shape_cast %125 : vector<16xf32> to vector<16x1xf32>
    %cst_70 = arith.constant 2.560000e+02 : f32
    %127 = vector.broadcast %cst_70 : f32 to vector<16x1xf32>
    %128 = arith.divf %126, %127 : vector<16x1xf32>
    %129 = vector.broadcast %128 : vector<16x1xf32> to vector<16x256xf32>
    %130 = arith.subf %124, %129 : vector<16x256xf32>
    %131 = arith.mulf %130, %130 : vector<16x256xf32>
    %cst_71 = arith.constant dense<0.000000e+00> : vector<16xf32>
    %132 = vector.multi_reduction <add>, %131, %cst_71 [1] : vector<16x256xf32> to vector<16xf32>
    %133 = vector.shape_cast %132 : vector<16xf32> to vector<16x1xf32>
    %cst_72 = arith.constant 2.560000e+02 : f32
    %134 = vector.broadcast %cst_72 : f32 to vector<16x1xf32>
    %135 = arith.divf %133, %134 : vector<16x1xf32>
    %cst_73 = arith.constant 9.99999974E-6 : f32
    %136 = vector.broadcast %cst_73 : f32 to vector<16x1xf32>
    %137 = arith.addf %135, %136 : vector<16x1xf32>
    %138 = math.rsqrt %137 : vector<16x1xf32>
    %139 = vector.broadcast %138 : vector<16x1xf32> to vector<16x256xf32>
    %140 = arith.mulf %130, %139 : vector<16x256xf32>
    %141 = arith.addf %1, %140 : vector<16x256xf32>
    %c0_74 = arith.constant 0 : index
    %c0_75 = arith.constant 0 : index
    %c0_76 = arith.constant 0 : index
    %142 = vector.load %arg6[%c0_74, %c0_75, %c0_76] : memref<1x16x256xf32, #tpu.memory_space<vmem>>, vector<1x16x256xf32>
    %143 = vector.shape_cast %142 : vector<1x16x256xf32> to vector<16x256xf32>
    %144 = vector.shape_cast %141 : vector<16x256xf32> to vector<1x16x256xf32>
    tpu.vector_store %arg6[%c0_74, %c0_75, %c0_76], %144 {strides = array<i32>} : memref<1x16x256xf32, #tpu.memory_space<vmem>>, vector<1x16x256xf32>,
    return
  }
  func.func @transform_0(%arg0: i32) -> (i32, i32, i32) {
    %c0_i32 = arith.constant 0 : i32
    %c0_i32_0 = arith.constant 0 : i32
    %c0_i32_1 = arith.constant 0 : i32
    return %arg0, %c0_i32, %c0_i32_0 : i32, i32, i32
  }
  func.func @transform_1(%arg0: i32) -> (i32, i32) {
    %c0_i32 = arith.constant 0 : i32
    %c0_i32_0 = arith.constant 0 : i32
    %c0_i32_1 = arith.constant 0 : i32
    return %c0_i32, %c0_i32_0 : i32, i32
  }
  func.func @transform_2(%arg0: i32) -> (i32, i32) {
    %c0_i32 = arith.constant 0 : i32
    %c0_i32_0 = arith.constant 0 : i32
    %c0_i32_1 = arith.constant 0 : i32
    return %c0_i32, %c0_i32_0 : i32, i32
  }
  func.func @transform_3(%arg0: i32) -> (i32, i32) {
    %c0_i32 = arith.constant 0 : i32
    %c0_i32_0 = arith.constant 0 : i32
    %c0_i32_1 = arith.constant 0 : i32
    return %c0_i32, %c0_i32_0 : i32, i32
  }
  func.func @transform_4(%arg0: i32) -> (i32, i32) {
    %c0_i32 = arith.constant 0 : i32
    %c0_i32_0 = arith.constant 0 : i32
    %c0_i32_1 = arith.constant 0 : i32
    return %c0_i32, %c0_i32_0 : i32, i32
  }
  func.func @transform_5(%arg0: i32) -> (i32, i32, i32) {
    %c0_i32 = arith.constant 0 : i32
    %c0_i32_0 = arith.constant 0 : i32
    %c0_i32_1 = arith.constant 0 : i32
    return %arg0, %c0_i32, %c0_i32_0 : i32, i32, i32
  }
}

</mosaic_0001>

<bundles_post_ra>
// kernel: tpu_custom_call.1
= control target key start
LH: loop header
LB: loop body
LE: loop exit
PB: predicated region body
PF: predicated region fallthrough
CT: control target
= control target key end

     0   :  { %10 = vsyncpa [#allocation4], 0  ;;  %s2306_s0 = inlined_call_operand.hbm [shape: f32[2,16,256], index: 0, kind: input, shape index: {}]   ;;  %s2307_s1 = inlined_call_operand.vmem [shape: bf16[16,144], index: 1, kind: input, shape index: {}]   ;;  %s2308_s2 = inlined_call_operand.vmem [shape: f32[16,1], index: 2, kind: input, shape index: {}]   ;;  %s2309_s3 = inlined_call_operand.vmem [shape: bf16[16,144], index: 3, kind: input, shape index: {}]   ;;  %s2310_s4 = inlined_call_operand.vmem [shape: f32[16,1], index: 4, kind: input, shape index: {}]   ;;  %s2311_s5 = inlined_call_operand.hbm [shape: f32[2,16,256], index: 5, kind: output, shape index: {}]  }
   0x1   :  { %12 = vsyncpa [#allocation4 + $0x1], 0 }
   0x2   :  { %13 = vsyncpa [#allocation5], 0 }
   0x3   :  { %15 = vsyncpa [#allocation5 + $0x1], 0  ;;  %s1794_s18 = smov 0   ;;  %s1796_s19 = smov 0  }
   0x4   :  { %s1798_s20 = smov 0   ;;  %s1800_s21 = smov 0  }
   0x5 LB: > { %s1815_s22 = sadd.s32 4294967295, %s1753_s21   ;;  %s1205_s23 = sadd.s32 4294967294, %s1753_s21   ;;  %s1753_s21 = sphi %s1800_s21, %s2329_s21   ;;  %s1749_s20 = sphi %s1798_s20, %s2328_s20   ;;  %s1745_s19 = sphi %s1796_s19, %s2327_s19   ;;  %s1741_s18 = sphi %s1794_s18, %s2326_s18  }
   0x6   : > { %s1819_s24 = sadd.s32 1, %s1753_s21   ;;  %s28_s25 = sadd.s32 1, %s1749_s20 }
   0x7   : > { %s25_s26 = ssub.s32 %s1753_s21, %s1819_s24  ;;  %p35_p0 = scmp.ne.s32.totalorder %s1749_s20, %s1745_s19 }
   0x8   : > { %p26_p1 = scmp.eq.s32.totalorder %s25_s26, 0  ;;  %p36_p2 = scmp.eq.s32.totalorder %s1753_s21, 0 }
   0x9   : > { %p41_p3 = scmp.ne.s32.totalorder %s1745_s19, %s1741_s18  ;;  %p42_p4 = scmp.eq.s32.totalorder %s1815_s22, 0 }
   0xa   : > { %s1831_s27 = scalar_select %p26_p1, %s1749_s20, %s28_s25  }
   0xb   : > { %p1833_p5 = por %p36_p2, %p35_p0  ;;  %p1837_p6 = por %p42_p4, %p41_p3 }
   0xc   : > { %p149_p7 = scmp.eq.s32.totalorder %s1815_s22, 1  ;;  %p155_p8 = scmp.eq.s32.totalorder %s1205_s23, 1 }
   0xd   : > { %p1437_p10 = scmp.lt.s32.totalorder %s1753_s21, 2  ;;  %s187_s7 = sand.u32 1, %s1749_s20  }
   0xe   : > { %p1844_p11 = por %p149_p7, %p35_p0  ;;  %p1848_p12 = por %p155_p8, %p41_p3 }
   0xf   : > { %s1383_s8 = sshll.u32 %s1753_s21, 5  ;;  %s1208_s9 = sshll.u32 %s187_s7, 5 }
  0x10   : > { %s196_s12 = scalar_lea.hbm %s2306_s0, %s1383_s8  ;;  %s191_s14 = scalar_lea.vmem [#allocation3], %s1208_s9 }
  0x11   : > { %s197_s13 = sshll.u32 %s196_s12, 4  ;;  %s199_s15 = sshll.u32 %s191_s14, 4  ;;  %s198_s13 = int_to_ptr.hbm [resolvable:$true] %s197_s13  ;;  %s200_s15 = int_to_ptr.vmem [resolvable:$true] %s199_s15 }
  0x12   : > { %p1859_p13 = pnand %p1437_p10, %p1833_p5  ;;  %p1211_p0 = scmp.ge.s32.totalorder %s1753_s21, 1 }
  0x13   : > { %p207_p1 = scmp.lt.s32.totalorder %s1753_s21, 3  ;;  %s188_s17 = scalar_lea.sflag [#allocation4], %s187_s7 }
  0x14   : > { %s1657_s23 = sshra.s32 %s198_s13, 4  ;;  %p1661_p3 = pneg %p1859_p13  ;;  %s1658_s23 = int_to_ptr.hbm [resolvable:$true] %s1657_s23 }
  0x15   : > { %s1659_s25 = scalar_lea.hbm %s1658_s23, 32  ;;  %s1664_s28 = scalar_lea.hbm %s2306_s0, 64 }
  0x16   : > { %p1660_p2 = scmp.ne.s32.totalorder %s1658_s23, %s1659_s25  ;;  %p1665_p5 = scmp.lt.s32.totalorder %s1658_s23, %s2306_s0 }
  0x17   : > { %p1666_p8 = scmp.lt.s32.totalorder %s1664_s28, %s1659_s25 }
  0x18   : > { %p1662_p4 = pnand %p1661_p3, %p1660_p2 }
  0x19   : > { %p1667_p10 = por %p1666_p8, %p1665_p5 }
  0x1a   : > { %p1663_p7 = pneg %p1662_p4 }
  0x1c   : > { %p1668_p9 = pnand %p1667_p10, %p1663_p7 }
  0x1e   : > { %1671 = shalt.err (!%p1668_p9)
}
  0x1f   : > { %s1755_s7 = smov 256   ;;  %s1756_s11 = smov 16  }
  0x20   : > { %1432 = dma.hbm_to_vmem [thread:$0]  (!%p1859_p13), %s198_s13, 512, %s200_s15, %s188_s17, %s1755_s7, %s1755_s7, %s1756_s11  }
  0x21   : > { %p208_p2 = pnand %p1211_p0, %p207_p1 }
  0x22   : > { %s1880_s12 = sand.u32 (!%p208_p2), 1, %s1745_s19  }
  0x23   : > { %211 = sbr.rel (%p208_p2) target bundleno = 1496 (0x5d8), region = 40  ;;  %s1212_s14 = sshll.u32 (!%p208_p2), %s1880_s12, 5 }
  0x24   : > { %s214_s23 = scalar_lea.sflag (!%p208_p2), [#allocation4], %s1880_s12  ;;  %s1886_s25 = scalar_lea.vmem (!%p208_p2), [#allocation3], %s1212_s14 }
  0x28   : > { %1732 = dma.done.wait (%p1837_p6), %s214_s23, 512  }
  0x29   : > { %1734 = vsyncadd (%p1837_p6), %s214_s23, 4294966784  ;;  %v246_v0 = vld [vmem:[%s1886_s25] sm:$0xff]  ;;  %v248_v1 = vld [vmem:[%s1886_s25 + $0x10] sm:$0xff]  ;;  %s1757_s13 = smov 112   ;;  %s1758_s15 = smov 16   ;;  %v250_v8 = vlaneseq  ;;  %vm583_vm9 = vcmask 130048  }
  0x2a   : > { %v247_v2 = vld [vmem:[%s1886_s25 + $0x8] sm:$0xff]  ;;  %v1895_v3 = vpack.i.bf16 %v248_v1, %v246_v0  ;;  %v249_v4 = vld [vmem:[%s1886_s25 + $0x18] sm:$0xff]  ;;  %s1759_s29 = smov 1   ;;  %s1760_s16 = smov 127   ;;  %v1404_v55 = vld [vmem:[%s2309_s3 + $0x4] sm:$0xf] }
  0x2b   : > { %v400_v5 = vpack.c.bf16 %v247_v2, %v246_v0  ;;  %v401_v6 = vpack.c.bf16 %v249_v4, %v248_v1  ;;  %v1902_v7 = vpack.i.bf16 %v249_v4, %v247_v2  ;;  %v1912_v11 = vand.u32 127, %v250_v8  ;;  %s244_s28 = scalar_lea.vmem [#allocation6], %s1212_s14  ;;  %s1117_s14 = scalar_lea.sflag [#allocation5], %s1880_s12 }
  0x2c   : > { %1491 = vrot.lane.b32.xlu1 %v1895_v3, %s1757_s13  ;;  %1481 = vrot.lane.b32.xlu0 %v1895_v3, %s1758_s15  ;;  %s1129_s10 = sshll.u32 %s244_s28, 4  ;;  %s1707_s26 = scalar_lea.hbm %s2311_s5, 64  ;;  %s1130_s10 = int_to_ptr.vmem [resolvable:$true] %s1129_s10 }
  0x2d   : > { %402 = vst [vmem:[#allocation2 + $0x40] sm:$0xff] %v400_v5  ;;  %1501 = vrot.lane.b32.xlu2 %v1895_v3, %s1759_s29  ;;  %v1915_v12 = vadd.s32 128, %v1912_v11  ;;  %vm305_vm0 = vcmp.lt.s32.totalorder %v1912_v11, 112  ;;  %vm277_vm1 = vcmp.lt.s32.totalorder %v1912_v11, 16  ;;  %vm326_vm3 = vcmp.lt.s32.totalorder %v1912_v11, 1 }
  0x2e   : > { %403 = vst [vmem:[#allocation2 + $0x48] sm:$0xff] %v401_v6  ;;  %v257_v54 = vand.u32 15, %v1912_v11  ;;  %vm339_vm4 = vcmp.lt.s32.totalorder %v1912_v11, 127 }
  0x2f   : > { %vm280_vm2 = vcmp.ge.s32.totalorder %v1915_v12, 240  ;;  %v264_v53 = vand.u32 15, %v1915_v12 }
  0x30   : > { %vm1968_vm7 = vcmp.eq.s32.totalorder %v257_v54, 0  ;;  %vm1972_vm8 = vcmp.eq.s32.totalorder %v257_v54, 15 }
  0x31   : > { %vm1960_vm5 = vcmp.eq.s32.totalorder %v264_v53, 0  ;;  %vm1964_vm6 = vcmp.eq.s32.totalorder %v264_v53, 15 }
  0x34   : > { %1496 = vrot.lane.b32.xlu1 %v1902_v7, %s1757_s13  ;;  %1486 = vrot.lane.b32.xlu0 %v1902_v7, %s1758_s15 }
  0x3c   : > { %1506 = vrot.lane.b32.xlu0 %v1902_v7, %s1759_s29 }
  0x87   : > { %v1502_v49 = vpop.permute.xlu2 %1501 }
  0x88   : > { %v1504_v59 = vunpack.i.h.bf16 %v1502_v49  ;;  %v1503_v60 = vunpack.i.l.bf16 %v1502_v49 }
  0x9e   : > { %v1492_v9 = vpop.permute.xlu1 %1491  ;;  %v1482_v10 = vpop.permute.xlu0 %1481 }
  0x9f   : > { %v1494_v13 = vunpack.i.h.bf16 %v1492_v9  ;;  %v1493_v14 = vunpack.i.l.bf16 %v1492_v9  ;;  %v1484_v21 = vunpack.i.h.bf16 %v1482_v10  ;;  %v1483_v22 = vunpack.i.l.bf16 %v1482_v10 }
  0xa6   : > { %v1497_v15 = vpop.permute.xlu1 %1496  ;;  %v1487_v16 = vpop.permute.xlu0 %1486 }
  0xa7   : > { %v1499_v17 = vunpack.i.h.bf16 %v1497_v15  ;;  %v1498_v18 = vunpack.i.l.bf16 %v1497_v15  ;;  %v1489_v19 = vunpack.i.h.bf16 %v1487_v16  ;;  %v1488_v20 = vunpack.i.l.bf16 %v1487_v16 }
  0xa9   : > { %v306_v23 = vsel %vm305_vm0, %v1493_v14, %v1498_v18  ;;  %v307_v24 = vsel %vm305_vm0, %v1494_v13, %v1499_v17  ;;  %v308_v25 = vsel %vm305_vm0, %v1498_v18, %v1493_v14  ;;  %v309_v26 = vsel %vm305_vm0, %v1499_v17, %v1494_v13 }
  0xaa   : > { %v293_v27 = vsel %vm277_vm1, %v1483_v22, %v1488_v20  ;;  %v294_v28 = vsel %vm277_vm1, %v1484_v21, %v1489_v19  ;;  %v295_v29 = vsel %vm277_vm1, %v1488_v20, %v1483_v22  ;;  %v296_v30 = vsel %vm277_vm1, %v1489_v19, %v1484_v21 }
  0xab   : > { %v1510_v31 = vpack.i.bf16 %v307_v24, %v306_v23  ;;  %v315_v32 = vsel %vm280_vm2, %v293_v27, %v308_v25  ;;  %v317_v33 = vsel %vm280_vm2, %v294_v28, %v309_v26  ;;  %v310_v37 = vsel %vm277_vm1, %v306_v23, %v295_v29 }
  0xac   : > { %v445_v34 = vpack.c.bf16 %v317_v33, %v307_v24  ;;  %v1525_v35 = vpack.i.bf16 %v317_v33, %v315_v32  ;;  %v444_v36 = vpack.c.bf16 %v315_v32, %v306_v23  ;;  %v312_v38 = vsel %vm277_vm1, %v307_v24, %v296_v30 }
  0xad   : > { %1511 = vrot.lane.b32.xlu2 %v1510_v31, %s1759_s29  ;;  %1516 = vrot.lane.b32.xlu0 %v1510_v31, %s1760_s16  ;;  %v356_v39 = vpack.c.bf16 %v293_v27, %v310_v37  ;;  %v357_v40 = vpack.c.bf16 %v294_v28, %v312_v38  ;;  %v1545_v41 = vpack.i.bf16 %v312_v38, %v310_v37 }
  0xae   : > { %447 = vst [vmem:[#allocation2 + $0x78] sm:$0xff] %v445_v34  ;;  %1526 = vrot.lane.b32.xlu1 %v1525_v35, %s1760_s16  ;;  %v1555_v48 = vpack.i.bf16 %v294_v28, %v293_v27  ;;  %v1507_v51 = vpop.permute.xlu0 %1506 }
  0xaf   : > { %446 = vst [vmem:[#allocation2 + $0x70] sm:$0xff] %v444_v36  ;;  %v1509_v61 = vunpack.i.h.bf16 %v1507_v51  ;;  %v1508_v27 = vunpack.i.l.bf16 %v1507_v51 }
  0xb0   : > { %359 = vst [vmem:[#allocation2 + $0x18] sm:$0xff] %v357_v40 }
  0xb1   : > { %358 = vst [vmem:[#allocation2 + $0x10] sm:$0xff] %v356_v39  ;;  %v373_v38 = vsel %vm326_vm3, %v1504_v59, %v1509_v61  ;;  %v375_v39 = vsel %vm326_vm3, %v1509_v61, %v1504_v59  ;;  %v372_v40 = vsel %vm326_vm3, %v1503_v60, %v1508_v27 }
  0xb5   : > { %1546 = vrot.lane.b32.xlu0 %v1545_v41, %s1759_s29  ;;  %1521 = vrot.lane.b32.xlu2 %v1525_v35, %s1759_s29  ;;  %v1401_v42 = vld [vmem:[#allocation2 + $0x74] sm:$0xf0]  ;;  %v1282_v43 = vld [vmem:[#allocation2 + $0x78] sm:$0xf0] }
  0xb6   : > { %1531 = vrot.lane.b32.xlu1 %v1895_v3, %s1760_s16  ;;  %v1280_v44 = vld [vmem:[#allocation2 + $0x70] sm:$0xf]  ;;  %v1400_v45 = vld [vmem:[#allocation2 + $0x74] sm:$0xf] }
  0xb7   : > { %v1281_v46 = vor.u32 %v1401_v42, %v1280_v44  ;;  %v1285_v47 = vor.u32 %v1400_v45, %v1282_v43 }
  0xb9   : > { %587 = vmatpush.bf16.msra.mxu0 %v1281_v46  ;;  %615 = vmatpush.bf16.msra.mxu2 %v1285_v47 }
  0xbd   : > { %1556 = vrot.lane.b32.xlu0 %v1555_v48, %s1760_s16  ;;  %1536 = vrot.lane.b32.xlu2 %v1902_v7, %s1760_s16 }
  0xbe   : > { %1541 = vrot.lane.b32.xlu1 %v1555_v48, %s1759_s29 }
  0xc5   : > { %1551 = vrot.lane.b32.xlu2 %v1545_v41, %s1760_s16  ;;  %v374_v41 = vsel %vm326_vm3, %v1508_v27, %v1503_v60 }
 0x107   : > { %v1512_v50 = vpop.permute.xlu2 %1511 }
 0x108   : > { %v1514_v63 = vunpack.i.h.bf16 %v1512_v50  ;;  %v1513_v0 = vunpack.i.l.bf16 %v1512_v50 }
 0x10f   : > { %v1522_v52 = vpop.permute.xlu2 %1521 }
 0x110   : > { %v1524_v56 = vunpack.i.h.bf16 %v1522_v52  ;;  %v1523_v57 = vunpack.i.l.bf16 %v1522_v52 }
 0x112   : > { %v417_v8 = vsel %vm326_vm3, %v1514_v63, %v1524_v56  ;;  %v419_v9 = vsel %vm326_vm3, %v1524_v56, %v1514_v63  ;;  %v416_v10 = vsel %vm326_vm3, %v1513_v0, %v1523_v57  ;;  %v418_v13 = vsel %vm326_vm3, %v1523_v57, %v1513_v0 }
 0x117   : > { %v1537_v14 = vpop.permute.xlu2 %1536 }
 0x118   : > { %v1539_v31 = vunpack.i.h.bf16 %v1537_v14  ;;  %v1538_v32 = vunpack.i.l.bf16 %v1537_v14 }
 0x11f   : > { %v1517_v62 = vpop.permute.xlu0 %1516  ;;  %v1552_v46 = vpop.permute.xlu2 %1551 }
 0x120   : > { %v1519_v1 = vunpack.i.h.bf16 %v1517_v62  ;;  %v1518_v2 = vunpack.i.l.bf16 %v1517_v62  ;;  %v1527_v3 = vpop.permute.xlu1 %1526  ;;  %v1554_v60 = vunpack.i.h.bf16 %v1552_v46  ;;  %v1553_v61 = vunpack.i.l.bf16 %v1552_v46 }
 0x121   : > { %v1529_v6 = vunpack.i.h.bf16 %v1527_v3  ;;  %v1528_v7 = vunpack.i.l.bf16 %v1527_v3 }
 0x123   : > { %v429_v15 = vsel %vm339_vm4, %v1519_v1, %v1529_v6  ;;  %v431_v16 = vsel %vm339_vm4, %v1529_v6, %v1519_v1  ;;  %v428_v17 = vsel %vm339_vm4, %v1518_v2, %v1528_v7  ;;  %v430_v18 = vsel %vm339_vm4, %v1528_v7, %v1518_v2 }
 0x124   : > { %v432_v19 = vsel %vm1968_vm7, %v428_v17, %v418_v13  ;;  %v433_v20 = vsel %vm1960_vm5, %v430_v18, %v416_v10  ;;  %v434_v21 = vsel %vm1968_vm7, %v429_v15, %v419_v9  ;;  %v435_v22 = vsel %vm1960_vm5, %v431_v16, %v417_v8 }
 0x125   : > { %v436_v23 = vsel %vm1972_vm8, %v418_v13, %v428_v17  ;;  %v437_v24 = vsel %vm1964_vm6, %v416_v10, %v430_v18  ;;  %v438_v25 = vsel %vm1972_vm8, %v419_v9, %v429_v15  ;;  %v439_v26 = vsel %vm1964_vm6, %v417_v8, %v431_v16 }
 0x126   : > { %v440_v28 = vpack.c.bf16 %v433_v20, %v432_v19  ;;  %v441_v29 = vpack.c.bf16 %v435_v22, %v434_v21  ;;  %v448_v30 = vpack.c.bf16 %v437_v24, %v436_v23  ;;  %v449_v33 = vpack.c.bf16 %v439_v26, %v438_v25 }
 0x127   : > { %v1547_v34 = vpop.permute.xlu0 %1546 }
 0x128   : > { %442 = vst [vmem:[#allocation2 + $0x60] sm:$0xff] %v440_v28  ;;  %v1532_v35 = vpop.permute.xlu1 %1531  ;;  %v1549_v2 = vunpack.i.h.bf16 %v1547_v34  ;;  %v1548_v3 = vunpack.i.l.bf16 %v1547_v34 }
 0x129   : > { %443 = vst [vmem:[#allocation2 + $0x68] sm:$0xff] %v441_v29  ;;  %v1534_v36 = vunpack.i.h.bf16 %v1532_v35  ;;  %v1533_v37 = vunpack.i.l.bf16 %v1532_v35  ;;  %v1384_v35 = vld [vmem:[%s2307_s1 + $0x4] sm:$0xf] }
 0x12a   : > { %450 = vst [vmem:[#allocation2 + $0x80] sm:$0xff] %v448_v30 }
 0x12b   : > { %451 = vst [vmem:[#allocation2 + $0x88] sm:$0xff] %v449_v33  ;;  %v384_v42 = vsel %vm339_vm4, %v1533_v37, %v1538_v32  ;;  %v385_v43 = vsel %vm339_vm4, %v1534_v36, %v1539_v31  ;;  %v386_v44 = vsel %vm339_vm4, %v1538_v32, %v1533_v37  ;;  %v387_v45 = vsel %vm339_vm4, %v1539_v31, %v1534_v36  ;;  %v1218_v36 = vld [vmem:[%s2307_s1 + $0x8] sm:$0xf0] }
 0x12c   : > { %v388_v47 = vsel %vm1968_vm7, %v384_v42, %v374_v41  ;;  %v389_v48 = vsel %vm1960_vm5, %v386_v44, %v372_v40  ;;  %v390_v49 = vsel %vm1968_vm7, %v385_v43, %v375_v39  ;;  %v391_v50 = vsel %vm1960_vm5, %v387_v45, %v373_v38 }
 0x12d   : > { %v392_v51 = vsel %vm1972_vm8, %v374_v41, %v384_v42  ;;  %v393_v52 = vsel %vm1964_vm6, %v372_v40, %v386_v44  ;;  %v394_v53 = vsel %vm1972_vm8, %v375_v39, %v385_v43  ;;  %v395_v54 = vsel %vm1964_vm6, %v373_v38, %v387_v45  ;;  %v1256_v42 = vld [vmem:[#allocation2 + $0x40] sm:$0xf]  ;;  %v1395_v43 = vld [vmem:[#allocation2 + $0x44] sm:$0xf0]  ;;  %v1394_v44 = vld [vmem:[#allocation2 + $0x44] sm:$0xf] }
 0x12e   : > { %v396_v56 = vpack.c.bf16 %v389_v48, %v388_v47  ;;  %v397_v57 = vpack.c.bf16 %v391_v50, %v390_v49  ;;  %v404_v59 = vpack.c.bf16 %v393_v52, %v392_v51  ;;  %v405_v62 = vpack.c.bf16 %v395_v54, %v394_v53  ;;  %v1258_v45 = vld [vmem:[#allocation2 + $0x48] sm:$0xf0] }
 0x12f   : > { %v1557_v63 = vpop.permute.xlu0 %1556  ;;  %v1272_v0 = vld [vmem:[#allocation2 + $0x60] sm:$0xf]  ;;  %v1398_v1 = vld [vmem:[#allocation2 + $0x64] sm:$0xf]  ;;  %v2078_v46 = vor.u32 %v1384_v35, %v1218_v36  ;;  %v1761_v51 = vmov 0   ;;  %v1257_v54 = vor.u32 %v1395_v43, %v1256_v42 }
 0x130   : > { %398 = vst [vmem:[#allocation2 + $0x30] sm:$0xff] %v396_v56  ;;  %v1559_v6 = vunpack.i.h.bf16 %v1557_v63  ;;  %v1558_v7 = vunpack.i.l.bf16 %v1557_v63  ;;  %v1542_v8 = vpop.permute.xlu1 %1541  ;;  %v1399_v9 = vld [vmem:[#allocation2 + $0x64] sm:$0xf0]  ;;  %v1274_v10 = vld [vmem:[#allocation2 + $0x68] sm:$0xf0]  ;;  %1560 = vset.pattern.permute.xlu1 %v1761_v51  ;;  %1561 = vset.pattern.permute.xlu2 %v1761_v51  ;;  %v1261_v56 = vor.u32 %v1394_v44, %v1258_v45 }
 0x131   : > { %399 = vst [vmem:[#allocation2 + $0x38] sm:$0xff] %v397_v57  ;;  %v1544_v13 = vunpack.i.h.bf16 %v1542_v8  ;;  %v1543_v14 = vunpack.i.l.bf16 %v1542_v8  ;;  %v1273_v15 = vor.u32 %v1399_v9, %v1272_v0  ;;  %v1277_v16 = vor.u32 %v1398_v1, %v1274_v10  ;;  %v1288_v29 = vld [vmem:[#allocation2 + $0x80] sm:$0xf]  ;;  %1642 = vset.pattern.permute.xlu0 %v1761_v51  ;;  %v1389_v10 = vld [vmem:[#allocation2 + $0x14] sm:$0xf0] }
 0x132   : > { %406 = vst [vmem:[#allocation2 + $0x50] sm:$0xff] %v404_v59  ;;  %v340_v17 = vsel %vm339_vm4, %v1553_v61, %v1558_v7  ;;  %v341_v18 = vsel %vm339_vm4, %v1554_v60, %v1559_v6  ;;  %v342_v19 = vsel %vm339_vm4, %v1558_v7, %v1553_v61  ;;  %v343_v20 = vsel %vm339_vm4, %v1559_v6, %v1554_v60  ;;  %v1403_v30 = vld [vmem:[#allocation2 + $0x84] sm:$0xf0]  ;;  %v472_v6 = vld [vmem:[%s2308_s2] sm:$0xff] }
 0x133   : > { %407 = vst [vmem:[#allocation2 + $0x58] sm:$0xff] %v405_v62  ;;  %v328_v21 = vsel %vm326_vm3, %v1549_v2, %v1544_v13  ;;  %v330_v22 = vsel %vm326_vm3, %v1544_v13, %v1549_v2  ;;  %v327_v23 = vsel %vm326_vm3, %v1548_v3, %v1543_v14  ;;  %v329_v24 = vsel %vm326_vm3, %v1543_v14, %v1548_v3  ;;  %v473_v7 = vld [vmem:[%s2308_s2 + $0x8] sm:$0xff]  ;;  %v1232_v13 = vld [vmem:[#allocation2 + $0x10] sm:$0xf]  ;;  %v1388_v14 = vld [vmem:[#allocation2 + $0x14] sm:$0xf] }
 0x134   : > { %v344_v25 = vsel %vm1968_vm7, %v340_v17, %v329_v24  ;;  %v345_v26 = vsel %vm1960_vm5, %v342_v19, %v327_v23  ;;  %v346_v27 = vsel %vm1968_vm7, %v341_v18, %v330_v22  ;;  %v347_v28 = vsel %vm1960_vm5, %v343_v20, %v328_v21  ;;  %588 = vmatpush.bf16.msra.mxu0 %v1273_v15  ;;  %v1234_v15 = vld [vmem:[#allocation2 + $0x18] sm:$0xf0] }
 0x135   : > { %v348_v31 = vsel %vm1972_vm8, %v329_v24, %v340_v17  ;;  %v349_v32 = vsel %vm1964_vm6, %v327_v23, %v342_v19  ;;  %v350_v33 = vsel %vm1972_vm8, %v330_v22, %v341_v18  ;;  %v351_v34 = vsel %vm1964_vm6, %v328_v21, %v343_v20  ;;  %616 = vmatpush.bf16.msra.mxu2 %v1277_v16  ;;  %v1402_v19 = vld [vmem:[#allocation2 + $0x84] sm:$0xf]  ;;  %v1290_v23 = vld [vmem:[#allocation2 + $0x88] sm:$0xf0]  ;;  %v1216_v24 = vld [vmem:[%s2307_s1] sm:$0xf] }
 0x136   : > { %v352_v37 = vpack.c.bf16 %v345_v26, %v344_v25  ;;  %v353_v38 = vpack.c.bf16 %v347_v28, %v346_v27  ;;  %v360_v39 = vpack.c.bf16 %v349_v32, %v348_v31  ;;  %v361_v40 = vpack.c.bf16 %v351_v34, %v350_v33  ;;  %476 = vperm.xlu1 %1560, %v472_v6   ;;  %v1385_v25 = vld [vmem:[%s2307_s1 + $0x4] sm:$0xf0] }
 0x137   : > { %v1289_v41 = vor.u32 %v1403_v30, %v1288_v29  ;;  %v1248_v57 = vld [vmem:[#allocation2 + $0x30] sm:$0xf]  ;;  %v1392_v60 = vld [vmem:[#allocation2 + $0x34] sm:$0xf]  ;;  %481 = vperm.xlu2 %1561, %v473_v7   ;;  %v1233_v16 = vor.u32 %v1389_v10, %v1232_v13  ;;  %v1237_v17 = vor.u32 %v1388_v14, %v1234_v15  ;;  %v1293_v28 = vor.u32 %v1402_v19, %v1290_v23 }
 0x138   : > { %354 = vst [vmem:[#allocation2] sm:$0xff] %v352_v37  ;;  %v1393_v59 = vld [vmem:[#allocation2 + $0x34] sm:$0xf0]  ;;  %v1250_v61 = vld [vmem:[#allocation2 + $0x38] sm:$0xf0]  ;;  %v1217_v29 = vor.u32 %v1385_v25, %v1216_v24 }
 0x139   : > { %355 = vst [vmem:[#allocation2 + $0x8] sm:$0xff] %v353_v38  ;;  %608 = vmatpush.bf16.msra.mxu1 %v1289_v41  ;;  %v1264_v47 = vld [vmem:[#allocation2 + $0x50] sm:$0xf]  ;;  %v1396_v48 = vld [vmem:[#allocation2 + $0x54] sm:$0xf]  ;;  %v1249_v62 = vor.u32 %v1393_v59, %v1248_v57  ;;  %v1253_v63 = vor.u32 %v1392_v60, %v1250_v61 }
 0x13a   : > { %362 = vst [vmem:[#allocation2 + $0x20] sm:$0xff] %v360_v39  ;;  %v1397_v49 = vld [vmem:[#allocation2 + $0x54] sm:$0xf0]  ;;  %v1266_v50 = vld [vmem:[#allocation2 + $0x58] sm:$0xf0] }
 0x13b   : > { %363 = vst [vmem:[#allocation2 + $0x28] sm:$0xff] %v361_v40  ;;  %v1265_v52 = vor.u32 %v1397_v49, %v1264_v47  ;;  %v1269_v53 = vor.u32 %v1396_v48, %v1266_v50  ;;  %v1762_v50 = vmov 256.0  }
 0x13c   : > { %1294 = vmatmul.msk.bf16.vlgmr.msra.gmra.mxu1 %vm583_vm9, %v2078_v46  ;;  %1643 = vrcp.f32 %v1762_v50 }
 0x13d   : > { %589 = vmatpush.bf16.msra.mxu0 %v1265_v52  ;;  %617 = vmatpush.bf16.msra.mxu2 %v1269_v53 }
 0x13f   : > { %v1224_v18 = vld [vmem:[#allocation2] sm:$0xf]  ;;  %v1386_v21 = vld [vmem:[#allocation2 + $0x4] sm:$0xf] }
 0x140   : > { %v1387_v20 = vld [vmem:[#allocation2 + $0x4] sm:$0xf0]  ;;  %v1226_v22 = vld [vmem:[#allocation2 + $0x8] sm:$0xf0] }
 0x141   : > { %590 = vmatpush.bf16.msra.mxu0 %v1257_v54  ;;  %618 = vmatpush.bf16.msra.mxu2 %v1261_v56  ;;  %v1240_v0 = vld [vmem:[#allocation2 + $0x20] sm:$0xf]  ;;  %v1390_v2 = vld [vmem:[#allocation2 + $0x24] sm:$0xf]  ;;  %v1225_v26 = vor.u32 %v1387_v20, %v1224_v18  ;;  %v1229_v27 = vor.u32 %v1386_v21, %v1226_v22 }
 0x142   : > { %v1391_v1 = vld [vmem:[#allocation2 + $0x24] sm:$0xf0]  ;;  %v1242_v3 = vld [vmem:[#allocation2 + $0x28] sm:$0xf0]  ;;  %v1644_v51 = vpop.eup %1643 }
 0x143   : > { %v1241_v8 = vor.u32 %v1391_v1, %v1240_v0  ;;  %v1245_v9 = vor.u32 %v1390_v2, %v1242_v3  ;;  %v650_v52 = vmul.f32 256.0, %v1644_v51  ;;  %vm654_vm10 = vweird.f32 %v1644_v51 }
 0x145   : > { %591 = vmatpush.bf16.msra.mxu0 %v1249_v62  ;;  %619 = vmatpush.bf16.msra.mxu2 %v1253_v63  ;;  %v651_v53 = vsub.f32 1.0, %v650_v52 }
 0x147   : > { %v652_v54 = vmul.f32 %v1644_v51, %v651_v53 }
 0x149   : > { %592 = vmatpush.bf16.msra.mxu0 %v1241_v8  ;;  %620 = vmatpush.bf16.msra.mxu2 %v1245_v9  ;;  %v653_v56 = vadd.f32 %v1644_v51, %v652_v54 }
 0x14b   : > { %v2096_v57 = vsel %vm654_vm10, %v1644_v51, %v653_v56 }
 0x14d   : > { %593 = vmatpush.bf16.msra.mxu0 %v1233_v16  ;;  %621 = vmatpush.bf16.msra.mxu2 %v1237_v17 }
 0x151   : > { %594 = vmatpush.bf16.msra.mxu0 %v1225_v26  ;;  %622 = vmatpush.bf16.msra.mxu2 %v1229_v27 }
 0x154   : > { %623 = vmatmul.bf16.vlgmr.msra.gmra.mxu2 %v1217_v29  ;;  %595 = vmatmul.bf16.vlgmr.msra.gmra.mxu0 %v1217_v29 }
 0x155   : > { %636 = vmatpush.bf16.msrb.mxu2 %v1293_v28 }
 0x164   : > { %1295 = vmatmul.msk.bf16.vlgmr.msrb.gmra.mxu2 %vm583_vm9, %v2078_v46 }
 0x191   : > { %v482_v42 = vpop.permute.xlu2 %481 }
 0x1a8   : > { %v477_v33 = vpop.permute.xlu1 %476 }
 0x1b9   : > { %v610_v35 = vpop.f32.mrf.mxu1 }
 0x1c1   : > { %v612_v44 = vpop.f32.mrf.mxu1 }
 0x1d1   : > { %v596_v31 = vpop.f32.mrf.mxu0 }
 0x1d2   : > { %v597_v34 = vadd.f32 %v596_v31, %v477_v33 }
 0x1d4   : > { %v611_v37 = vadd.f32 %v610_v35, %v597_v34 }
 0x1d7   : > { %v624_v30 = vpop.f32.mrf.mxu2 }
 0x1d8   : > { %v625_v36 = vadd.f32 %v624_v30, %v477_v33 }
 0x1d9   : > { %v598_v40 = vpop.f32.mrf.mxu0 }
 0x1da   : > { %v599_v43 = vadd.f32 %v598_v40, %v482_v42 }
 0x1dc   : > { %v613_v48 = vadd.f32 %v612_v44, %v599_v43 }
 0x1df   : > { %v626_v32 = vpop.f32.mrf.mxu2 }
 0x1e0   : > { %v627_v45 = vadd.f32 %v626_v32, %v482_v42 }
 0x1e7   : > { %v638_v38 = vpop.f32.mrf.mxu2 }
 0x1e8   : > { %v639_v39 = vadd.f32 %v638_v38, %v625_v36 }
 0x1ea   : > { %v643_v41 = vadd.f32 %v639_v39, %v611_v37 }
 0x1ec   : > { %644 = vadd.xlane.f32.xlu0 %v643_v41 }
 0x1ef   : > { %v640_v47 = vpop.f32.mrf.mxu2 }
 0x1f0   : > { %v641_v46 = vadd.f32 %v640_v47, %v627_v45 }
 0x1f2   : > { %v646_v49 = vadd.f32 %v641_v46, %v613_v48 }
 0x1f4   : > { %647 = vadd.xlane.f32.xlu1 %v646_v49 }
 0x25f   : > { %v645_v59 = vpop.xlane.xlu0 %644 }
 0x260   : > { %v656_v60 = vmul.f32 %v2096_v57, %v645_v59 }
 0x262   : > { %v658_v61 = vsub.f32 %v611_v37, %v656_v60  ;;  %v659_v62 = vsub.f32 %v639_v39, %v656_v60 }
 0x264   : > { %v662_v63 = vmul.f32 %v658_v61, %v658_v61  ;;  %v663_v0 = vmul.f32 %v659_v62, %v659_v62 }
 0x266   : > { %v666_v1 = vadd.f32 %v663_v0, %v662_v63 }
 0x267   : > { %v648_v2 = vpop.xlane.xlu1 %647 }
 0x268   : > { %v657_v3 = vmul.f32 %v2096_v57, %v648_v2  ;;  %667 = vadd.xlane.f32.xlu2 %v666_v1 }
 0x26a   : > { %v660_v6 = vsub.f32 %v613_v48, %v657_v3  ;;  %v661_v7 = vsub.f32 %v641_v46, %v657_v3 }
 0x26c   : > { %v664_v8 = vmul.f32 %v660_v6, %v660_v6  ;;  %v665_v9 = vmul.f32 %v661_v7, %v661_v7 }
 0x26e   : > { %v669_v10 = vadd.f32 %v665_v9, %v664_v8 }
 0x270   : > { %670 = vadd.xlane.f32.xlu2 %v669_v10 }
 0x2db   : > { %v668_v13 = vpop.xlane.xlu2 %667 }
 0x2dc   : > { %v672_v14 = vmul.f32 %v668_v13, %v2096_v57 }
 0x2de   : > { %v674_v15 = vadd.f32 1e-05, %v672_v14 }
 0x2e0   : > { %1645 = vrsqrt.f32 %v674_v15  ;;  %vm682_vm12 = vweird.f32 %v674_v15 }
 0x2e3   : > { %v671_v16 = vpop.xlane.xlu2 %670 }
 0x2e4   : > { %v673_v17 = vmul.f32 %v671_v16, %v2096_v57 }
 0x2e6   : > { %v1646_v18 = vpop.eup %1645  ;;  %v675_v19 = vadd.f32 1e-05, %v673_v17 }
 0x2e7   : > { %v677_v20 = vmul.f32 %v1646_v18, %v674_v15  ;;  %vm683_vm11 = vweird.f32 %v1646_v18 }
 0x2e8   : > { %1647 = vrsqrt.f32 %v675_v19  ;;  %vm684_vm13 = vmor %vm682_vm12, %vm683_vm11  ;;  %vm692_vm15 = vweird.f32 %v675_v19 }
 0x2e9   : > { %v678_v21 = vmul.f32 %v1646_v18, %v677_v20 }
 0x2eb   : > { %v679_v22 = vmul.f32 0.5, %v678_v21 }
 0x2ed   : > { %v680_v23 = vsub.f32 1.5, %v679_v22  ;;  %v888_v22 = vld [vmem:[%s2310_s4] sm:$0xff] }
 0x2ee   : > { %v1648_v24 = vpop.eup %1647 }
 0x2ef   : > { %v681_v25 = vmul.f32 %v1646_v18, %v680_v23  ;;  %v687_v26 = vmul.f32 %v1648_v24, %v675_v19  ;;  %vm693_vm14 = vweird.f32 %v1648_v24 }
 0x2f0   : > { %vm694_vm10 = vmor %vm692_vm15, %vm693_vm14 }
 0x2f1   : > { %v685_v27 = vsel %vm684_vm13, %v1646_v18, %v681_v25  ;;  %v688_v28 = vmul.f32 %v1648_v24, %v687_v26 }
 0x2f2   : > { %v696_v29 = vmul.f32 %v685_v27, %v658_v61  ;;  %v697_v30 = vmul.f32 %v685_v27, %v659_v62 }
 0x2f3   : > { %v689_v31 = vmul.f32 0.5, %v688_v28 }
 0x2f4   : > { %v700_v32 = vmax.f32 %v696_v29, 0.0  ;;  %v701_v33 = vmax.f32 %v697_v30, 0.0 }
 0x2f5   : > { %v690_v34 = vsub.f32 1.5, %v689_v31 }
 0x2f6   : > { %v816_v35 = vpack.c.bf16 %v701_v33, %v700_v32 }
 0x2f7   : > { %v691_v36 = vmul.f32 %v1648_v24, %v690_v34 }
 0x2f8   : > { %818 = vst [vmem:[#allocation2 + $0x40] sm:$0xff] %v816_v35 }
 0x2f9   : > { %v695_v37 = vsel %vm694_vm10, %v1648_v24, %v691_v36 }
 0x2fa   : > { %v698_v38 = vmul.f32 %v695_v37, %v660_v6  ;;  %v699_v39 = vmul.f32 %v695_v37, %v661_v7 }
 0x2fc   : > { %v702_v40 = vmax.f32 %v698_v38, 0.0  ;;  %v703_v41 = vmax.f32 %v699_v39, 0.0 }
 0x2fe   : > { %v817_v42 = vpack.c.bf16 %v703_v41, %v702_v40  ;;  %v1567_v43 = vpack.i.bf16 %v703_v41, %v701_v33  ;;  %v1572_v44 = vpack.i.bf16 %v702_v40, %v700_v32 }
 0x300   : > { %819 = vst [vmem:[#allocation2 + $0x48] sm:$0xff] %v817_v42  ;;  %1568 = vrot.lane.b32.xlu1 %v1567_v43, %s1758_s15  ;;  %1573 = vrot.lane.b32.xlu2 %v1572_v44, %s1757_s13 }
 0x301   : > { %1563 = vrot.lane.b32.xlu0 %v1572_v44, %s1758_s15 }
 0x308   : > { %1588 = vrot.lane.b32.xlu2 %v1567_v43, %s1759_s29 }
 0x309   : > { %1578 = vrot.lane.b32.xlu0 %v1567_v43, %s1757_s13  ;;  %s1424_s13 = sshll.u32 %s1815_s22, 5 }
 0x30a   : > { %s1128_s9 = scalar_lea.hbm %s2311_s5, %s1424_s13 }
 0x30b   : > { %s1131_s22 = sshll.u32 %s1128_s9, 4  ;;  %s1132_s22 = int_to_ptr.hbm [resolvable:$true] %s1131_s22 }
 0x30c   : > { %s1701_s7 = sshra.s32 %s1132_s22, 4  ;;  %s1702_s7 = int_to_ptr.hbm [resolvable:$true] %s1701_s7 }
 0x30d   : > { %s1703_s11 = scalar_lea.hbm %s1702_s7, 32  ;;  %p1708_p0 = scmp.lt.s32.totalorder %s1702_s7, %s2311_s5 }
 0x30e   : > { %p1704_p6 = scmp.ne.s32.totalorder %s1702_s7, %s1703_s11  ;;  %p1709_p1 = scmp.lt.s32.totalorder %s1707_s26, %s1703_s11 }
 0x310   : > { %p1705_p9 = pnand %p1704_p6, %p1844_p11  ;;  %p1710_p3 = por %p1709_p1, %p1708_p0 }
 0x311   : > { %1583 = vrot.lane.b32.xlu0 %v1572_v44, %s1759_s29 }
 0x312   : > { %p1706_p13 = pneg %p1705_p9 }
 0x314   : > { %p1711_p4 = pnand %p1710_p3, %p1706_p13 }
 0x35a   : > { %v1574_v48 = vpop.permute.xlu2 %1573 }
 0x35b   : > { %v1576_v53 = vunpack.i.h.bf16 %v1574_v48  ;;  %v1575_v54 = vunpack.i.l.bf16 %v1574_v48 }
 0x362   : > { %v1589_v23 = vpop.permute.xlu2 %1588 }
 0x363   : > { %v1591_v32 = vunpack.i.h.bf16 %v1589_v23 }
 0x372   : > { %v1569_v47 = vpop.permute.xlu1 %1568 }
 0x373   : > { %v1564_v45 = vpop.permute.xlu0 %1563  ;;  %v1571_v46 = vunpack.i.h.bf16 %v1569_v47  ;;  %v1570_v49 = vunpack.i.l.bf16 %v1569_v47 }
 0x374   : > { %v1566_v50 = vunpack.i.h.bf16 %v1564_v45  ;;  %v1565_v51 = vunpack.i.l.bf16 %v1564_v45 }
 0x376   : > { %v713_v60 = vsel %vm277_vm1, %v1566_v50, %v1571_v46  ;;  %v715_v61 = vsel %vm277_vm1, %v1571_v46, %v1566_v50  ;;  %v712_v62 = vsel %vm277_vm1, %v1565_v51, %v1570_v49  ;;  %v714_v63 = vsel %vm277_vm1, %v1570_v49, %v1565_v51 }
 0x377   : > { %v1637_v21 = vpack.i.bf16 %v713_v60, %v712_v62 }
 0x37b   : > { %v1579_v52 = vpop.permute.xlu0 %1578 }
 0x37c   : > { %v1581_v56 = vunpack.i.h.bf16 %v1579_v52  ;;  %v1580_v59 = vunpack.i.l.bf16 %v1579_v52 }
 0x37e   : > { %v725_v0 = vsel %vm305_vm0, %v1576_v53, %v1581_v56  ;;  %v727_v1 = vsel %vm305_vm0, %v1581_v56, %v1576_v53  ;;  %v724_v2 = vsel %vm305_vm0, %v1575_v54, %v1580_v59  ;;  %v726_v3 = vsel %vm305_vm0, %v1580_v59, %v1575_v54 }
 0x37f   : > { %v1597_v6 = vpack.i.bf16 %v725_v0, %v724_v2  ;;  %v733_v7 = vsel %vm280_vm2, %v712_v62, %v726_v3  ;;  %v735_v8 = vsel %vm280_vm2, %v713_v60, %v727_v1  ;;  %v728_v14 = vsel %vm277_vm1, %v724_v2, %v714_v63 }
 0x380   : > { %v861_v9 = vpack.c.bf16 %v735_v8, %v725_v0  ;;  %v1602_v10 = vpack.i.bf16 %v735_v8, %v733_v7  ;;  %v860_v13 = vpack.c.bf16 %v733_v7, %v724_v2  ;;  %v730_v15 = vsel %vm277_vm1, %v725_v0, %v715_v61 }
 0x381   : > { %1598 = vrot.lane.b32.xlu2 %v1597_v6, %s1760_s16  ;;  %1593 = vrot.lane.b32.xlu1 %v1597_v6, %s1759_s29  ;;  %v772_v16 = vpack.c.bf16 %v712_v62, %v728_v14  ;;  %v773_v17 = vpack.c.bf16 %v713_v60, %v730_v15  ;;  %v1627_v12 = vpack.i.bf16 %v730_v15, %v728_v14  ;;  %v1590_v1 = vunpack.i.l.bf16 %v1589_v23 }
 0x382   : > { %863 = vst [vmem:[#allocation2 + $0x78] sm:$0xff] %v861_v9  ;;  %1603 = vrot.lane.b32.xlu0 %v1602_v10, %s1759_s29 }
 0x383   : > { %862 = vst [vmem:[#allocation2 + $0x70] sm:$0xff] %v860_v13  ;;  %v1584_v24 = vpop.permute.xlu0 %1583 }
 0x384   : > { %775 = vst [vmem:[#allocation2 + $0x18] sm:$0xff] %v773_v17  ;;  %v1586_v33 = vunpack.i.h.bf16 %v1584_v24  ;;  %v1585_v60 = vunpack.i.l.bf16 %v1584_v24 }
 0x385   : > { %774 = vst [vmem:[#allocation2 + $0x10] sm:$0xff] %v772_v16 }
 0x386   : > { %v789_v2 = vsel %vm326_vm3, %v1586_v33, %v1591_v32  ;;  %v791_v13 = vsel %vm326_vm3, %v1591_v32, %v1586_v33  ;;  %v788_v14 = vsel %vm326_vm3, %v1585_v60, %v1590_v1  ;;  %v790_v15 = vsel %vm326_vm3, %v1590_v1, %v1585_v60 }
 0x389   : > { %1628 = vrot.lane.b32.xlu2 %v1627_v12, %s1759_s29  ;;  %1608 = vrot.lane.b32.xlu1 %v1602_v10, %s1760_s16  ;;  %v1421_v18 = vld [vmem:[#allocation2 + $0x74] sm:$0xf0] }
 0x38a   : > { %1618 = vrot.lane.b32.xlu0 %v1567_v43, %s1760_s16  ;;  %v1362_v19 = vld [vmem:[#allocation2 + $0x70] sm:$0xf] }
 0x38b   : > { %v1363_v20 = vor.u32 %v1421_v18, %v1362_v19 }
 0x38d   : > { %1002 = vmatpush.bf16.msrb.mxu1 %v1363_v20 }
 0x391   : > { %1638 = vrot.lane.b32.xlu2 %v1637_v21, %s1760_s16  ;;  %1613 = vrot.lane.b32.xlu1 %v1572_v44, %s1760_s16 }
 0x392   : > { %1633 = vrot.lane.b32.xlu0 %v1627_v12, %s1760_s16 }
 0x399   : > { %1623 = vrot.lane.b32.xlu1 %v1637_v21, %s1759_s29 }
 0x3a1   : > { %892 = vperm.xlu1 %1560, %v888_v22  }
 0x3db   : > { %v1599_v26 = vpop.permute.xlu2 %1598 }
 0x3dc   : > { %v1601_v35 = vunpack.i.h.bf16 %v1599_v26  ;;  %v1600_v36 = vunpack.i.l.bf16 %v1599_v26 }
 0x3e3   : > { %v2153_v44 = vpop.permute.xlu2 %1628 }
 0x3eb   : > { %v1639_v24 = vpop.permute.xlu2 %1638 }
 0x3f3   : > { %v1594_v25 = vpop.permute.xlu1 %1593 }
 0x3f4   : > { %v1604_v27 = vpop.permute.xlu0 %1603  ;;  %v1596_v28 = vunpack.i.h.bf16 %v1594_v25  ;;  %v1595_v29 = vunpack.i.l.bf16 %v1594_v25 }
 0x3f5   : > { %v1606_v30 = vunpack.i.h.bf16 %v1604_v27  ;;  %v1605_v31 = vunpack.i.l.bf16 %v1604_v27 }
 0x3f7   : > { %v833_v40 = vsel %vm326_vm3, %v1596_v28, %v1606_v30  ;;  %v835_v41 = vsel %vm326_vm3, %v1606_v30, %v1596_v28  ;;  %v832_v42 = vsel %vm326_vm3, %v1595_v29, %v1605_v31  ;;  %v834_v43 = vsel %vm326_vm3, %v1605_v31, %v1595_v29 }
 0x3fb   : > { %v1609_v34 = vpop.permute.xlu1 %1608 }
 0x3fc   : > { %v1611_v37 = vunpack.i.h.bf16 %v1609_v34  ;;  %v1610_v38 = vunpack.i.l.bf16 %v1609_v34  ;;  %v1619_v39 = vpop.permute.xlu0 %1618 }
 0x3fd   : > { %v1621_v6 = vunpack.i.h.bf16 %v1619_v39  ;;  %v1620_v7 = vunpack.i.l.bf16 %v1619_v39 }
 0x3fe   : > { %v845_v45 = vsel %vm339_vm4, %v1601_v35, %v1611_v37  ;;  %v847_v47 = vsel %vm339_vm4, %v1611_v37, %v1601_v35  ;;  %v844_v48 = vsel %vm339_vm4, %v1600_v36, %v1610_v38  ;;  %v846_v46 = vsel %vm339_vm4, %v1610_v38, %v1600_v36 }
 0x3ff   : > { %v848_v49 = vsel %vm1968_vm7, %v844_v48, %v834_v43  ;;  %v849_v50 = vsel %vm1960_vm5, %v846_v46, %v832_v42  ;;  %v850_v51 = vsel %vm1968_vm7, %v845_v45, %v835_v41  ;;  %v851_v52 = vsel %vm1960_vm5, %v847_v47, %v833_v40 }
 0x400   : > { %v852_v53 = vsel %vm1972_vm8, %v834_v43, %v844_v48  ;;  %v853_v54 = vsel %vm1964_vm6, %v832_v42, %v846_v46  ;;  %v854_v56 = vsel %vm1972_vm8, %v835_v41, %v845_v45  ;;  %v855_v59 = vsel %vm1964_vm6, %v833_v40, %v847_v47 }
 0x401   : > { %v856_v61 = vpack.c.bf16 %v849_v50, %v848_v49  ;;  %v857_v62 = vpack.c.bf16 %v851_v52, %v850_v51  ;;  %v864_v63 = vpack.c.bf16 %v853_v54, %v852_v53  ;;  %v865_v0 = vpack.c.bf16 %v855_v59, %v854_v56  ;;  %v1364_v53 = vld [vmem:[#allocation2 + $0x78] sm:$0xf0] }
 0x402   : > { %v1631_v35 = vunpack.i.h.bf16 %v2153_v44  ;;  %v1641_v36 = vunpack.i.h.bf16 %v1639_v24  ;;  %v1640_v37 = vunpack.i.l.bf16 %v1639_v24  ;;  %v1630_v40 = vunpack.i.l.bf16 %v2153_v44  ;;  %v1338_v24 = vld [vmem:[#allocation2 + $0x40] sm:$0xf] }
 0x403   : > { %858 = vst [vmem:[#allocation2 + $0x60] sm:$0xff] %v856_v61  ;;  %v1614_v3 = vpop.permute.xlu1 %1613 }
 0x404   : > { %859 = vst [vmem:[#allocation2 + $0x68] sm:$0xff] %v857_v62  ;;  %v1616_v8 = vunpack.i.h.bf16 %v1614_v3  ;;  %v1615_v9 = vunpack.i.l.bf16 %v1614_v3  ;;  %v1634_v10 = vpop.permute.xlu0 %1633  ;;  %v1300_v3 = vld [vmem:[%s2309_s3 + $0x8] sm:$0xf0] }
 0x405   : > { %866 = vst [vmem:[#allocation2 + $0x80] sm:$0xff] %v864_v63  ;;  %v1636_v16 = vunpack.i.h.bf16 %v1634_v10  ;;  %v1635_v32 = vunpack.i.l.bf16 %v1634_v10  ;;  %v1303_v58 = vor.u32 %v1404_v55, %v1300_v3 }
 0x406   : > { %867 = vst [vmem:[#allocation2 + $0x88] sm:$0xff] %v865_v0  ;;  %v800_v17 = vsel %vm339_vm4, %v1615_v9, %v1620_v7  ;;  %v801_v12 = vsel %vm339_vm4, %v1616_v8, %v1621_v6  ;;  %v802_v18 = vsel %vm339_vm4, %v1620_v7, %v1615_v9  ;;  %v803_v19 = vsel %vm339_vm4, %v1621_v6, %v1616_v8 }
 0x407   : > { %v804_v20 = vsel %vm1968_vm7, %v800_v17, %v790_v15  ;;  %v805_v21 = vsel %vm1960_vm5, %v802_v18, %v788_v14  ;;  %v806_v22 = vsel %vm1968_vm7, %v801_v12, %v791_v13  ;;  %v807_v23 = vsel %vm1960_vm5, %v803_v19, %v789_v2 }
 0x408   : > { %v808_v25 = vsel %vm1972_vm8, %v790_v15, %v800_v17  ;;  %v809_v26 = vsel %vm1964_vm6, %v788_v14, %v802_v18  ;;  %v810_v27 = vsel %vm1972_vm8, %v791_v13, %v801_v12  ;;  %v811_v28 = vsel %vm1964_vm6, %v789_v2, %v803_v19  ;;  %v1420_v2 = vld [vmem:[#allocation2 + $0x74] sm:$0xf]  ;;  %v889_v17 = vld [vmem:[%s2310_s4 + $0x8] sm:$0xff] }
 0x409   : > { %v812_v29 = vpack.c.bf16 %v805_v21, %v804_v20  ;;  %v813_v30 = vpack.c.bf16 %v807_v23, %v806_v22  ;;  %v820_v31 = vpack.c.bf16 %v809_v26, %v808_v25  ;;  %v821_v33 = vpack.c.bf16 %v811_v28, %v810_v27  ;;  %897 = vperm.xlu0 %1642, %v889_v17   ;;  %v1415_v22 = vld [vmem:[#allocation2 + $0x44] sm:$0xf0]  ;;  %v1340_v28 = vld [vmem:[#allocation2 + $0x48] sm:$0xf0] }
 0x40a   : > { %v1354_v34 = vld [vmem:[#allocation2 + $0x60] sm:$0xf]  ;;  %v757_v45 = vsel %vm339_vm4, %v1636_v16, %v1641_v36  ;;  %v759_v47 = vsel %vm339_vm4, %v1641_v36, %v1636_v16  ;;  %v756_v48 = vsel %vm339_vm4, %v1635_v32, %v1640_v37  ;;  %v758_v46 = vsel %vm339_vm4, %v1640_v37, %v1635_v32  ;;  %v1418_v14 = vld [vmem:[#allocation2 + $0x64] sm:$0xf] }
 0x40b   : > { %814 = vst [vmem:[#allocation2 + $0x30] sm:$0xff] %v812_v29  ;;  %v1624_v38 = vpop.permute.xlu1 %1623  ;;  %v1419_v39 = vld [vmem:[#allocation2 + $0x64] sm:$0xf0]  ;;  %v1367_v5 = vor.u32 %v1420_v2, %v1364_v53  ;;  %v1356_v15 = vld [vmem:[#allocation2 + $0x68] sm:$0xf0]  ;;  %v1339_v25 = vor.u32 %v1415_v22, %v1338_v24 }
 0x40c   : > { %815 = vst [vmem:[#allocation2 + $0x38] sm:$0xff] %v813_v30  ;;  %v1626_v41 = vunpack.i.h.bf16 %v1624_v38  ;;  %v1625_v42 = vunpack.i.l.bf16 %v1624_v38  ;;  %v1355_v43 = vor.u32 %v1419_v39, %v1354_v34  ;;  %v1370_v52 = vld [vmem:[#allocation2 + $0x80] sm:$0xf]  ;;  %v1422_v62 = vld [vmem:[#allocation2 + $0x84] sm:$0xf]  ;;  %v1359_v21 = vor.u32 %v1418_v14, %v1356_v15 }
 0x40d   : > { %822 = vst [vmem:[#allocation2 + $0x50] sm:$0xff] %v820_v31  ;;  %v1423_v61 = vld [vmem:[#allocation2 + $0x84] sm:$0xf0]  ;;  %v1372_v63 = vld [vmem:[#allocation2 + $0x88] sm:$0xf0] }
 0x40e   : > { %823 = vst [vmem:[#allocation2 + $0x58] sm:$0xff] %v821_v33  ;;  %v745_v44 = vsel %vm326_vm3, %v1631_v35, %v1626_v41  ;;  %v747_v49 = vsel %vm326_vm3, %v1626_v41, %v1631_v35  ;;  %v744_v50 = vsel %vm326_vm3, %v1630_v40, %v1625_v42  ;;  %v746_v51 = vsel %vm326_vm3, %v1625_v42, %v1630_v40  ;;  %v1414_v29 = vld [vmem:[#allocation2 + $0x44] sm:$0xf]  ;;  %v1314_v38 = vld [vmem:[#allocation2 + $0x10] sm:$0xf] }
 0x40f   : > { %v760_v54 = vsel %vm1968_vm7, %v756_v48, %v746_v51  ;;  %v761_v56 = vsel %vm1960_vm5, %v758_v46, %v744_v50  ;;  %v762_v59 = vsel %vm1968_vm7, %v757_v45, %v747_v49  ;;  %v763_v60 = vsel %vm1960_vm5, %v759_v47, %v745_v44  ;;  %1003 = vmatpush.bf16.msrb.mxu1 %v1355_v43  ;;  %v1409_v39 = vld [vmem:[#allocation2 + $0x14] sm:$0xf0] }
 0x410   : > { %v764_v11 = vsel %vm1972_vm8, %v746_v51, %v756_v48  ;;  %v765_v0 = vsel %vm1964_vm6, %v744_v50, %v758_v46  ;;  %v766_v1 = vsel %vm1972_vm8, %v747_v49, %v757_v45  ;;  %v767_v4 = vsel %vm1964_vm6, %v745_v44, %v759_v47  ;;  %v1316_v45 = vld [vmem:[#allocation2 + $0x18] sm:$0xf0]  ;;  %v1408_v46 = vld [vmem:[#allocation2 + $0x14] sm:$0xf]  ;;  %v1298_v44 = vld [vmem:[%s2309_s3] sm:$0xf] }
 0x411   : > { %v768_v6 = vpack.c.bf16 %v761_v56, %v760_v54  ;;  %v769_v7 = vpack.c.bf16 %v763_v60, %v762_v59  ;;  %v776_v8 = vpack.c.bf16 %v765_v0, %v764_v11  ;;  %v777_v9 = vpack.c.bf16 %v767_v4, %v766_v1  ;;  %v1405_v49 = vld [vmem:[%s2309_s3 + $0x4] sm:$0xf0] }
 0x412   : > { %v1371_v10 = vor.u32 %v1423_v61, %v1370_v52  ;;  %v1375_v13 = vor.u32 %v1422_v62, %v1372_v63  ;;  %v1330_v26 = vld [vmem:[#allocation2 + $0x30] sm:$0xf]  ;;  %v1343_v31 = vor.u32 %v1414_v29, %v1340_v28  ;;  %v1412_v34 = vld [vmem:[#allocation2 + $0x34] sm:$0xf]  ;;  %v1315_v42 = vor.u32 %v1409_v39, %v1314_v38 }
 0x413   : > { %770 = vst [vmem:[#allocation2] sm:$0xff] %v768_v6  ;;  %v1413_v27 = vld [vmem:[#allocation2 + $0x34] sm:$0xf0]  ;;  %v1332_v35 = vld [vmem:[#allocation2 + $0x38] sm:$0xf0]  ;;  %v1319_v51 = vor.u32 %v1408_v46, %v1316_v45  ;;  %v1299_v52 = vor.u32 %v1405_v49, %v1298_v44  ;;  %v893_v62 = vpop.permute.xlu1 %892 }
 0x414   : > { %771 = vst [vmem:[#allocation2 + $0x8] sm:$0xff] %v769_v7  ;;  %1023 = vmatpush.bf16.msra.mxu3 %v1371_v10  ;;  %1051 = vmatpush.bf16.msrb.mxu0 %v1375_v13  ;;  %v1346_v16 = vld [vmem:[#allocation2 + $0x50] sm:$0xf]  ;;  %v1416_v19 = vld [vmem:[#allocation2 + $0x54] sm:$0xf]  ;;  %v1331_v30 = vor.u32 %v1413_v27, %v1330_v26  ;;  %v1335_v37 = vor.u32 %v1412_v34, %v1332_v35  ;;  %v1654_v46 = vld [vmem:[%s1886_s25 + $0x8] sm:$0xff] }
 0x415   : > { %778 = vst [vmem:[#allocation2 + $0x20] sm:$0xff] %v776_v8  ;;  %v1417_v12 = vld [vmem:[#allocation2 + $0x54] sm:$0xf0]  ;;  %v1348_v20 = vld [vmem:[#allocation2 + $0x58] sm:$0xf0] }
 0x416   : > { %779 = vst [vmem:[#allocation2 + $0x28] sm:$0xff] %v777_v9  ;;  %v1347_v18 = vor.u32 %v1417_v12, %v1346_v16  ;;  %v1351_v23 = vor.u32 %v1416_v19, %v1348_v20 }
 0x417   : > { %1376 = vmatmul.msk.bf16.vlgmr.msra.gmra.mxu3 %vm583_vm9, %v1303_v58  ;;  %1377 = vmatmul.msk.bf16.vlgmr.msrb.gmra.mxu0 %vm583_vm9, %v1303_v58 }
 0x418   : > { %1030 = vmatpush.bf16.msrb.mxu3 %v1367_v5  ;;  %1004 = vmatpush.bf16.msrb.mxu1 %v1347_v18 }
 0x41a   : > { %v1306_v47 = vld [vmem:[#allocation2] sm:$0xf]  ;;  %v1406_v53 = vld [vmem:[#allocation2 + $0x4] sm:$0xf] }
 0x41b   : > { %v1407_v48 = vld [vmem:[#allocation2 + $0x4] sm:$0xf0]  ;;  %v1308_v54 = vld [vmem:[#allocation2 + $0x8] sm:$0xf0] }
 0x41c   : > { %1031 = vmatpush.bf16.msrb.mxu3 %v1359_v21  ;;  %1005 = vmatpush.bf16.msrb.mxu1 %v1339_v25  ;;  %v1322_v32 = vld [vmem:[#allocation2 + $0x20] sm:$0xf]  ;;  %v1410_v40 = vld [vmem:[#allocation2 + $0x24] sm:$0xf]  ;;  %v1307_v50 = vor.u32 %v1407_v48, %v1306_v47  ;;  %v1311_v56 = vor.u32 %v1406_v53, %v1308_v54  ;;  %v1653_v47 = vld [vmem:[%s1886_s25] sm:$0xff] }
 0x41d   : > { %v1411_v33 = vld [vmem:[#allocation2 + $0x24] sm:$0xf0]  ;;  %v1324_v41 = vld [vmem:[#allocation2 + $0x28] sm:$0xf0]  ;;  %v1655_v54 = vld [vmem:[%s1886_s25 + $0x10] sm:$0xff] }
 0x41e   : > { %v1323_v36 = vor.u32 %v1411_v33, %v1322_v32  ;;  %v1327_v43 = vor.u32 %v1410_v40, %v1324_v41 }
 0x420   : > { %1032 = vmatpush.bf16.msrb.mxu3 %v1351_v23  ;;  %1006 = vmatpush.bf16.msrb.mxu1 %v1331_v30 }
 0x424   : > { %1033 = vmatpush.bf16.msrb.mxu3 %v1343_v31  ;;  %1007 = vmatpush.bf16.msrb.mxu1 %v1323_v36 }
 0x428   : > { %1034 = vmatpush.bf16.msrb.mxu3 %v1335_v37  ;;  %1008 = vmatpush.bf16.msrb.mxu1 %v1315_v42 }
 0x42c   : > { %1035 = vmatpush.bf16.msrb.mxu3 %v1327_v43  ;;  %1009 = vmatpush.bf16.msrb.mxu1 %v1307_v50 }
 0x42f   : > { %1010 = vmatmul.bf16.vlgmr.msrb.gmra.mxu1 %v1299_v52 }
 0x430   : > { %1036 = vmatpush.bf16.msrb.mxu3 %v1319_v51 }
 0x434   : > { %1037 = vmatpush.bf16.msrb.mxu3 %v1311_v56 }
 0x437   : > { %1038 = vmatmul.bf16.vlgmr.msrb.gmra.mxu3 %v1299_v52 }
 0x47b   : > { %v898_v55 = vpop.permute.xlu0 %897 }
 0x494   : > { %v1053_v11 = vpop.f32.mrf.mxu0 }
 0x49a   : > { %v1025_v59 = vpop.f32.mrf.mxu3 }
 0x49c   : > { %v1055_v10 = vpop.f32.mrf.mxu0 }
 0x4a2   : > { %v1027_v60 = vpop.f32.mrf.mxu3 }
 0x4ac   : > { %v1011_v61 = vpop.f32.mrf.mxu1 }
 0x4ad   : > { %v1012_v63 = vadd.f32 %v1011_v61, %v893_v62 }
 0x4af   : > { %v1026_v4 = vadd.f32 %v1025_v59, %v1012_v63  ;;  %v1656_v59 = vld [vmem:[%s1886_s25 + $0x18] sm:$0xff] }
 0x4b4   : > { %v1013_v3 = vpop.f32.mrf.mxu1 }
 0x4b5   : > { %v1014_v7 = vadd.f32 %v1013_v3, %v898_v55 }
 0x4b7   : > { %v1028_v13 = vadd.f32 %v1027_v60, %v1014_v7 }
 0x4ba   : > { %v1039_v0 = vpop.f32.mrf.mxu3 }
 0x4bb   : > { %v1040_v1 = vadd.f32 %v1039_v0, %v893_v62 }
 0x4bd   : > { %v1054_v2 = vadd.f32 %v1053_v11, %v1040_v1 }
 0x4bf   : > { %v1058_v6 = vadd.f32 %v1054_v2, %v1026_v4 }
 0x4c1   : > { %1059 = vadd.xlane.f32.xlu2 %v1058_v6 }
 0x4c2   : > { %v1041_v8 = vpop.f32.mrf.mxu3 }
 0x4c3   : > { %v1042_v9 = vadd.f32 %v1041_v8, %v898_v55 }
 0x4c5   : > { %v1056_v5 = vadd.f32 %v1055_v10, %v1042_v9 }
 0x4c7   : > { %v1061_v14 = vadd.f32 %v1056_v5, %v1028_v13 }
 0x4c9   : > { %1062 = vadd.xlane.f32.xlu1 %v1061_v14 }
 0x534   : > { %v1060_v58 = vpop.xlane.xlu2 %1059 }
 0x535   : > { %v1064_v15 = vmul.f32 %v1060_v58, %v2096_v57 }
 0x537   : > { %v1066_v16 = vsub.f32 %v1026_v4, %v1064_v15  ;;  %v1067_v17 = vsub.f32 %v1054_v2, %v1064_v15 }
 0x539   : > { %v1070_v12 = vmul.f32 %v1066_v16, %v1066_v16  ;;  %v1071_v18 = vmul.f32 %v1067_v17, %v1067_v17 }
 0x53b   : > { %v1074_v19 = vadd.f32 %v1071_v18, %v1070_v12 }
 0x53c   : > { %v1063_v20 = vpop.xlane.xlu1 %1062 }
 0x53d   : > { %v1065_v21 = vmul.f32 %v1063_v20, %v2096_v57  ;;  %1075 = vadd.xlane.f32.xlu0 %v1074_v19 }
 0x53f   : > { %v1068_v22 = vsub.f32 %v1028_v13, %v1065_v21  ;;  %v1069_v23 = vsub.f32 %v1056_v5, %v1065_v21 }
 0x541   : > { %v1072_v24 = vmul.f32 %v1068_v22, %v1068_v22  ;;  %v1073_v25 = vmul.f32 %v1069_v23, %v1069_v23 }
 0x543   : > { %v1077_v26 = vadd.f32 %v1073_v25, %v1072_v24 }
 0x545   : > { %1078 = vadd.xlane.f32.xlu2 %v1077_v26 }
 0x5b0   : > { %v1076_v27 = vpop.xlane.xlu0 %1075 }
 0x5b1   : > { %v1080_v28 = vmul.f32 %v1076_v27, %v2096_v57 }
 0x5b3   : > { %v1082_v29 = vadd.f32 1e-05, %v1080_v28 }
 0x5b5   : > { %1649 = vrsqrt.f32 %v1082_v29  ;;  %vm1090_vm1 = vweird.f32 %v1082_v29 }
 0x5b8   : > { %v1079_v30 = vpop.xlane.xlu2 %1078 }
 0x5b9   : > { %v1081_v31 = vmul.f32 %v1079_v30, %v2096_v57 }
 0x5bb   : > { %v1650_v32 = vpop.eup %1649  ;;  %v1083_v33 = vadd.f32 1e-05, %v1081_v31 }
 0x5bc   : > { %v1085_v34 = vmul.f32 %v1650_v32, %v1082_v29  ;;  %vm1091_vm0 = vweird.f32 %v1650_v32 }
 0x5bd   : > { %1651 = vrsqrt.f32 %v1083_v33  ;;  %vm1092_vm2 = vmor %vm1090_vm1, %vm1091_vm0  ;;  %vm1100_vm4 = vweird.f32 %v1083_v33 }
 0x5be   : > { %v1086_v35 = vmul.f32 %v1650_v32, %v1085_v34 }
 0x5c0   : > { %v1087_v36 = vmul.f32 0.5, %v1086_v35 }
 0x5c2   : > { %v1088_v37 = vsub.f32 1.5, %v1087_v36 }
 0x5c3   : > { %v1652_v38 = vpop.eup %1651 }
 0x5c4   : > { %v1089_v39 = vmul.f32 %v1650_v32, %v1088_v37  ;;  %v1095_v40 = vmul.f32 %v1652_v38, %v1083_v33  ;;  %vm1101_vm3 = vweird.f32 %v1652_v38 }
 0x5c5   : > { %vm1102_vm5 = vmor %vm1100_vm4, %vm1101_vm3 }
 0x5c6   : > { %v1093_v41 = vsel %vm1092_vm2, %v1650_v32, %v1089_v39  ;;  %v1096_v42 = vmul.f32 %v1652_v38, %v1095_v40 }
 0x5c7   : > { %v1104_v57 = vmul.f32 %v1093_v41, %v1066_v16  ;;  %v1105_v43 = vmul.f32 %v1093_v41, %v1067_v17 }
 0x5c8   : > { %v1097_v45 = vmul.f32 0.5, %v1096_v42 }
 0x5c9   : > { %v1108_v48 = vadd.f32 %v1653_v47, %v1104_v57  ;;  %v1109_v44 = vadd.f32 %v1654_v46, %v1105_v43 }
 0x5ca   : > { %v1098_v49 = vsub.f32 1.5, %v1097_v45 }
 0x5cb   : > { %1112 = vst [vmem:[%s244_s28] sm:$0xff] %v1108_v48 }
 0x5cc   : > { %1113 = vst [vmem:[%s244_s28 + $0x8] sm:$0xff] %v1109_v44  ;;  %v1099_v50 = vmul.f32 %v1652_v38, %v1098_v49 }
 0x5ce   : > { %v1103_v51 = vsel %vm1102_vm5, %v1652_v38, %v1099_v50 }
 0x5cf   : > { %v1106_v52 = vmul.f32 %v1103_v51, %v1068_v22  ;;  %v1107_v53 = vmul.f32 %v1103_v51, %v1069_v23 }
 0x5d1   : > { %v1110_v56 = vadd.f32 %v1655_v54, %v1106_v52  ;;  %v1111_v60 = vadd.f32 %v1656_v59, %v1107_v53 }
 0x5d3   : > { %1114 = vst [vmem:[%s244_s28 + $0x10] sm:$0xff] %v1110_v56 }
 0x5d4   : > { %1115 = vst [vmem:[%s244_s28 + $0x18] sm:$0xff] %v1111_v60 }
 0x5d5   : > { %1714 = shalt.err (!%p1711_p4)
}
 0x5d6   : > { %s1763_s12 = smov 256  }
 0x5d7   : > { %1427 = dma.vmem_to_hbm [thread:$0]  (%p1844_p11), %s1130_s10, 512, %s1132_s22, %s1117_s14, %s1763_s12, %s1763_s12, %s1758_s15  }
 0x5d8 PF: > { %s1146_s25 = sand.u32 1, %s1741_s18   ;;  %p2325_p7 = scmp.ge.s32.totalorder %s1753_s21, 2 }
 0x5d9   : > { %s1147_s28 = scalar_lea.sflag [#allocation5], %s1146_s25 }
 0x5da   : > { %p1434_p5 = pnand %p2325_p7, %p1848_p12 }
 0x5dc   : > { %p1435_p8 = pneg %p1434_p5 }
 0x5de   : > { %1736 = dma.done.wait (%p1435_p8), %s1147_s28, 512  }
 0x5df   : > { %1738 = vsyncadd (%p1435_p8), %s1147_s28, 4294966784  ;;  %p18_p10 = scmp.ge.s32.totalorder %s1819_s24, 4   ;;  %s2326_s18 = smov %s1745_s19 }
 0x5e0   : > { %s2327_s19 = smov %s1749_s20  ;;  %s2328_s20 = smov %s1831_s27 }
 0x5e1   : > { %s2329_s21 = smov %s1819_s24  ;;  %20 = sbr.rel (!%p18_p10) target bundleno = 5 (0x5), region = 85 }
 0x5e6   :  { %1153 = vsyncpa [#allocation4], 1 }
 0x5e7   :  { %1155 = vsyncpa [#allocation4 + $0x1], 1 }
 0x5e8   :  { %1156 = vsyncpa [#allocation5], 1 }
 0x5e9   :  { %1158 = vsyncpa [#allocation5 + $0x1], 1 }

</bundles_post_ra>
